<compile_context>
chip_gen: v7x
topology: tpu7x:2x2x1
jax: 0.10.0
libtpu: 0.0.40
codegen_flags: <defaults>
</compile_context>

<pallas_src>
import functools
import math

import jax
import jax.numpy as jnp
from jax.experimental import pallas as pl
from jax.experimental.pallas import tpu as pltpu


HIDDEN_DIM = 128
IN_DIM = 28 * 28          # 784
H1 = 512


def _cdiv(a, b):
    return (a + b - 1) // b


def _round_up(x, m):
    return _cdiv(x, m) * m


def autoencoder_kernel(x_ref,
                       w1_ref, b1_ref,   # encoder.layer1: 784 -> 512
                       w2_ref, b2_ref,   # encoder.layer2: 512 -> hidden
                       w3_ref, b3_ref,   # decoder.layer1: hidden -> 512
                       w4_ref, b4_ref,   # decoder.layer2: 512 -> 784
                       out_ref):
    # Raw f32 input tile; the f32->bf16 cast is cheap VPU work hidden under the MXU.
    x = x_ref[...].astype(jnp.bfloat16)
    h = jnp.dot(x, w1_ref[...], preferred_element_type=jnp.float32) + b1_ref[...]
    h = jnp.dot(h.astype(jnp.bfloat16), w2_ref[...],
                preferred_element_type=jnp.float32) + b2_ref[...]
    h = jnp.dot(h.astype(jnp.bfloat16), w3_ref[...],
                preferred_element_type=jnp.float32) + b3_ref[...]
    y = jnp.dot(h.astype(jnp.bfloat16), w4_ref[...],
                preferred_element_type=jnp.float32) + b4_ref[...]
    out_ref[...] = y.astype(out_ref.dtype)


def init_linear_params(key, in_dim, out_dim, dtype=jnp.float32):
    """Deterministic init mimicking torch.nn.Linear's uniform(-1/sqrt(fan_in), ...)."""
    kw, kb = jax.random.split(key)
    bound = 1.0 / math.sqrt(in_dim)
    # Stored as [in_dim, out_dim] (transposed vs. torch) so the kernel does x @ W.
    w = jax.random.uniform(kw, (in_dim, out_dim), dtype, minval=-bound, maxval=bound)
    b = jax.random.uniform(kb, (out_dim,), dtype, minval=-bound, maxval=bound)
    return w, b


def init_autoencoder_params(key, hidden_dim=HIDDEN_DIM, dtype=jnp.float32):
    k1, k2, k3, k4 = jax.random.split(key, 4)
    return [
        init_linear_params(k1, IN_DIM, H1, dtype),        # encoder.layer1
        init_linear_params(k2, H1, hidden_dim, dtype),    # encoder.layer2
        init_linear_params(k3, hidden_dim, H1, dtype),    # decoder.layer1
        init_linear_params(k4, H1, IN_DIM, dtype),        # decoder.layer2
    ]


def _prepare_operands(params):
    """bf16 weights [in, out] (no padding); f32 biases as [1, out] rows."""
    (w1, b1), (w2, b2), (w3, b3), (w4, b4) = params
    hidden = w2.shape[1]
    return (
        w1.astype(jnp.bfloat16), b1.astype(jnp.float32).reshape(1, H1),
        w2.astype(jnp.bfloat16), b2.astype(jnp.float32).reshape(1, hidden),
        w3.astype(jnp.bfloat16), b3.astype(jnp.float32).reshape(1, H1),
        w4.astype(jnp.bfloat16), b4.astype(jnp.float32).reshape(1, IN_DIM),
    )


@functools.partial(jax.jit, static_argnames=("block_m",))
def autoencoder_forward(x, params, block_m=512):
    """x: [B, 784] -> y: [B, 784], matching autoencoder.forward semantics."""
    B = x.shape[0]

    # Balanced batch tiling: keep >=2 grid steps when B is large enough (v7x
    # megacore), spread rows evenly across steps, round tile to sublane (x16).
    n_steps = _cdiv(B, block_m)
    if B >= 32:
        n_steps = max(n_steps, 2)
    tm = min(_round_up(_cdiv(B, n_steps), 16), _round_up(B, 8))
    grid = (_cdiv(B, tm),)

    ops = _prepare_operands(params)
    hidden = ops[2].shape[1]

    flops = 2 * B * (IN_DIM * H1 + H1 * hidden + hidden * H1 + H1 * IN_DIM)
    bytes_accessed = (B * IN_DIM * 4            # f32 input
                      + B * IN_DIM * 4          # f32 output
                      + sum(int(o.size) * o.dtype.itemsize for o in ops))

    def full_spec(arr):
        # Whole-array operand, same block every grid step -> stays VMEM-resident.
        return pl.BlockSpec(arr.shape, lambda i: (0, 0))

    out = pl.pallas_call(
        autoencoder_kernel,
        out_shape=jax.ShapeDtypeStruct((B, IN_DIM), jnp.float32),
        grid=grid,
        in_specs=[pl.BlockSpec((tm, IN_DIM), lambda i: (i, 0))]
                 + [full_spec(o) for o in ops],
        out_specs=pl.BlockSpec((tm, IN_DIM), lambda i: (i, 0)),
        compiler_params=pltpu.CompilerParams(
            dimension_semantics=("parallel",)),
        cost_estimate=pl.CostEstimate(
            flops=flops, transcendentals=0, bytes_accessed=bytes_accessed),
    )(x.astype(jnp.float32), *ops)

    return out.astype(x.dtype)


def autoencoder_reference(x, params):
    """Pure-JAX reference mirroring the kernel's bf16-input / f32-accum math."""
    h = x.astype(jnp.float32)
    for w, b in params:
        h = jnp.dot(h.astype(jnp.bfloat16), w.astype(jnp.bfloat16),
                    preferred_element_type=jnp.float32) + b.astype(jnp.float32)
    return h


if __name__ == "__main__":
    key = jax.random.PRNGKey(0)
    k_params, k_x1, k_x2 = jax.random.split(key, 3)

    params = init_autoencoder_params(k_params, hidden_dim=HIDDEN_DIM)

    # Small sanity batch (single grid step, tm=8).
    batch = 8
    x = jax.random.normal(k_x1, (batch, IN_DIM), dtype=jnp.float32)
    y = jax.block_until_ready(autoencoder_forward(x, params))
    y_ref = autoencoder_reference(x, params)
    assert y.shape == (batch, IN_DIM)
    assert jnp.allclose(y, y_ref, atol=1e-2, rtol=1e-2), "mismatch vs reference (B=8)"

    # Larger batch exercising balanced tiling + masked partial trailing block
    # (B=300 -> tm=160, grid=2, last block 140 valid rows).
    batch2 = 300
    x2 = jax.random.normal(k_x2, (batch2, IN_DIM), dtype=jnp.float32)
    y2 = jax.block_until_ready(autoencoder_forward(x2, params))
    y2_ref = autoencoder_reference(x2, params)
    assert y2.shape == (batch2, IN_DIM)
    assert jnp.allclose(y2, y2_ref, atol=1e-2, rtol=1e-2), "mismatch vs reference (B=300)"

    print("KERNEL_OK")
</pallas_src>

<mosaic_0001>
module attributes {stable_mosaic.version = 11 : i64} {
  func.func @autoencoder_kernel(%arg0: i32, %arg1: memref<8x784xf32, #tpu.memory_space<vmem>>, %arg2: memref<784x512xbf16, #tpu.memory_space<vmem>>, %arg3: memref<1x512xf32, #tpu.memory_space<vmem>>, %arg4: memref<512x128xbf16, #tpu.memory_space<vmem>>, %arg5: memref<1x128xf32, #tpu.memory_space<vmem>>, %arg6: memref<128x512xbf16, #tpu.memory_space<vmem>>, %arg7: memref<1x512xf32, #tpu.memory_space<vmem>>, %arg8: memref<512x784xbf16, #tpu.memory_space<vmem>>, %arg9: memref<1x784xf32, #tpu.memory_space<vmem>>, %arg10: memref<8x784xf32, #tpu.memory_space<vmem>>) attributes {dimension_semantics = [#tpu.dimension_semantics<parallel>], iteration_bounds = array<i64: 1>, scalar_prefetch = 0 : i64, scratch_operands = 0 : i64, tpu.core_type = #tpu.core_type<tc>, window_params = [{transform_indices = @transform_0, window_bounds = array<i64: 8, 784>}, {pipeline_mode = #tpu.pipeline_mode<synchronous>, transform_indices = @transform_1, window_bounds = array<i64: 784, 512>}, {pipeline_mode = #tpu.pipeline_mode<synchronous>, transform_indices = @transform_2, window_bounds = array<i64: 1, 512>}, {pipeline_mode = #tpu.pipeline_mode<synchronous>, transform_indices = @transform_3, window_bounds = array<i64: 512, 128>}, {pipeline_mode = #tpu.pipeline_mode<synchronous>, transform_indices = @transform_4, window_bounds = array<i64: 1, 128>}, {pipeline_mode = #tpu.pipeline_mode<synchronous>, transform_indices = @transform_5, window_bounds = array<i64: 128, 512>}, {pipeline_mode = #tpu.pipeline_mode<synchronous>, transform_indices = @transform_6, window_bounds = array<i64: 1, 512>}, {pipeline_mode = #tpu.pipeline_mode<synchronous>, transform_indices = @transform_7, window_bounds = array<i64: 512, 784>}, {pipeline_mode = #tpu.pipeline_mode<synchronous>, transform_indices = @transform_8, window_bounds = array<i64: 1, 784>}, {transform_indices = @transform_9, window_bounds = array<i64: 8, 784>}]} {
    %c0 = arith.constant 0 : index
    %c0_0 = arith.constant 0 : index
    %0 = vector.load %arg1[%c0, %c0_0] : memref<8x784xf32, #tpu.memory_space<vmem>>, vector<8x784xf32>
    %1 = arith.truncf %0 : vector<8x784xf32> to vector<8x784xbf16>
    %c0_1 = arith.constant 0 : index
    %c0_2 = arith.constant 0 : index
    %2 = vector.load %arg2[%c0_1, %c0_2] : memref<784x512xbf16, #tpu.memory_space<vmem>>, vector<784x512xbf16>
    %cst = arith.constant dense<0.000000e+00> : vector<8x512xf32>
    %3 = tpu.matmul %1, %2, %cst {dimension_numbers = #tpu.dot_dimension_numbers<[1], [0], [0], [1], [0, 0, 1, 1], [], []>} : vector<8x784xbf16>, vector<784x512xbf16>, vector<8x512xf32> -> vector<8x512xf32>
    %c0_3 = arith.constant 0 : index
    %c0_4 = arith.constant 0 : index
    %4 = vector.load %arg3[%c0_3, %c0_4] : memref<1x512xf32, #tpu.memory_space<vmem>>, vector<1x512xf32>
    %5 = vector.broadcast %4 : vector<1x512xf32> to vector<8x512xf32>
    %6 = arith.addf %3, %5 : vector<8x512xf32>
    %7 = arith.truncf %6 : vector<8x512xf32> to vector<8x512xbf16>
    %c0_5 = arith.constant 0 : index
    %c0_6 = arith.constant 0 : index
    %8 = vector.load %arg4[%c0_5, %c0_6] : memref<512x128xbf16, #tpu.memory_space<vmem>>, vector<512x128xbf16>
    %cst_7 = arith.constant dense<0.000000e+00> : vector<8x128xf32>
    %9 = tpu.matmul %7, %8, %cst_7 {dimension_numbers = #tpu.dot_dimension_numbers<[1], [0], [0], [1], [0, 0, 1, 1], [], []>} : vector<8x512xbf16>, vector<512x128xbf16>, vector<8x128xf32> -> vector<8x128xf32>
    %c0_8 = arith.constant 0 : index
    %c0_9 = arith.constant 0 : index
    %10 = vector.load %arg5[%c0_8, %c0_9] : memref<1x128xf32, #tpu.memory_space<vmem>>, vector<1x128xf32>
    %11 = vector.broadcast %10 : vector<1x128xf32> to vector<8x128xf32>
    %12 = arith.addf %9, %11 : vector<8x128xf32>
    %13 = arith.truncf %12 : vector<8x128xf32> to vector<8x128xbf16>
    %c0_10 = arith.constant 0 : index
    %c0_11 = arith.constant 0 : index
    %14 = vector.load %arg6[%c0_10, %c0_11] : memref<128x512xbf16, #tpu.memory_space<vmem>>, vector<128x512xbf16>
    %cst_12 = arith.constant dense<0.000000e+00> : vector<8x512xf32>
    %15 = tpu.matmul %13, %14, %cst_12 {dimension_numbers = #tpu.dot_dimension_numbers<[1], [0], [0], [1], [0, 0, 1, 1], [], []>} : vector<8x128xbf16>, vector<128x512xbf16>, vector<8x512xf32> -> vector<8x512xf32>
    %c0_13 = arith.constant 0 : index
    %c0_14 = arith.constant 0 : index
    %16 = vector.load %arg7[%c0_13, %c0_14] : memref<1x512xf32, #tpu.memory_space<vmem>>, vector<1x512xf32>
    %17 = vector.broadcast %16 : vector<1x512xf32> to vector<8x512xf32>
    %18 = arith.addf %15, %17 : vector<8x512xf32>
    %19 = arith.truncf %18 : vector<8x512xf32> to vector<8x512xbf16>
    %c0_15 = arith.constant 0 : index
    %c0_16 = arith.constant 0 : index
    %20 = vector.load %arg8[%c0_15, %c0_16] : memref<512x784xbf16, #tpu.memory_space<vmem>>, vector<512x784xbf16>
    %cst_17 = arith.constant dense<0.000000e+00> : vector<8x784xf32>
    %21 = tpu.matmul %19, %20, %cst_17 {dimension_numbers = #tpu.dot_dimension_numbers<[1], [0], [0], [1], [0, 0, 1, 1], [], []>} : vector<8x512xbf16>, vector<512x784xbf16>, vector<8x784xf32> -> vector<8x784xf32>
    %c0_18 = arith.constant 0 : index
    %c0_19 = arith.constant 0 : index
    %22 = vector.load %arg9[%c0_18, %c0_19] : memref<1x784xf32, #tpu.memory_space<vmem>>, vector<1x784xf32>
    %23 = vector.broadcast %22 : vector<1x784xf32> to vector<8x784xf32>
    %24 = arith.addf %21, %23 : vector<8x784xf32>
    %c0_20 = arith.constant 0 : index
    %c0_21 = arith.constant 0 : index
    %25 = vector.load %arg10[%c0_20, %c0_21] : memref<8x784xf32, #tpu.memory_space<vmem>>, vector<8x784xf32>
    tpu.vector_store %arg10[%c0_20, %c0_21], %24 {strides = array<i32>} : memref<8x784xf32, #tpu.memory_space<vmem>>, vector<8x784xf32>,
    return
  }
  func.func @transform_0(%arg0: i32) -> (i32, i32) {
    %c0_i32 = arith.constant 0 : i32
    %c0_i32_0 = arith.constant 0 : i32
    return %arg0, %c0_i32 : i32, i32
  }
  func.func @transform_1(%arg0: i32) -> (i32, i32) {
    %c0_i32 = arith.constant 0 : i32
    %c0_i32_0 = arith.constant 0 : i32
    %c0_i32_1 = arith.constant 0 : i32
    return %c0_i32, %c0_i32_0 : i32, i32
  }
  func.func @transform_2(%arg0: i32) -> (i32, i32) {
    %c0_i32 = arith.constant 0 : i32
    %c0_i32_0 = arith.constant 0 : i32
    %c0_i32_1 = arith.constant 0 : i32
    return %c0_i32, %c0_i32_0 : i32, i32
  }
  func.func @transform_3(%arg0: i32) -> (i32, i32) {
    %c0_i32 = arith.constant 0 : i32
    %c0_i32_0 = arith.constant 0 : i32
    %c0_i32_1 = arith.constant 0 : i32
    return %c0_i32, %c0_i32_0 : i32, i32
  }
  func.func @transform_4(%arg0: i32) -> (i32, i32) {
    %c0_i32 = arith.constant 0 : i32
    %c0_i32_0 = arith.constant 0 : i32
    %c0_i32_1 = arith.constant 0 : i32
    return %c0_i32, %c0_i32_0 : i32, i32
  }
  func.func @transform_5(%arg0: i32) -> (i32, i32) {
    %c0_i32 = arith.constant 0 : i32
    %c0_i32_0 = arith.constant 0 : i32
    %c0_i32_1 = arith.constant 0 : i32
    return %c0_i32, %c0_i32_0 : i32, i32
  }
  func.func @transform_6(%arg0: i32) -> (i32, i32) {
    %c0_i32 = arith.constant 0 : i32
    %c0_i32_0 = arith.constant 0 : i32
    %c0_i32_1 = arith.constant 0 : i32
    return %c0_i32, %c0_i32_0 : i32, i32
  }
  func.func @transform_7(%arg0: i32) -> (i32, i32) {
    %c0_i32 = arith.constant 0 : i32
    %c0_i32_0 = arith.constant 0 : i32
    %c0_i32_1 = arith.constant 0 : i32
    return %c0_i32, %c0_i32_0 : i32, i32
  }
  func.func @transform_8(%arg0: i32) -> (i32, i32) {
    %c0_i32 = arith.constant 0 : i32
    %c0_i32_0 = arith.constant 0 : i32
    %c0_i32_1 = arith.constant 0 : i32
    return %c0_i32, %c0_i32_0 : i32, i32
  }
  func.func @transform_9(%arg0: i32) -> (i32, i32) {
    %c0_i32 = arith.constant 0 : i32
    %c0_i32_0 = arith.constant 0 : i32
    return %arg0, %c0_i32 : i32, i32
  }
}

</mosaic_0001>

<bundles_post_ra>
// kernel: autoencoder_forward.1
= control target key start
LH: loop header
LB: loop body
LE: loop exit
PB: predicated region body
PF: predicated region fallthrough
CT: control target
= control target key end

     0   :  { %vm1246_vm0 = vcmask 130048   ;;  %s6977_s0 = inlined_call_operand.vmem [shape: f32[8,784], index: 0, kind: input, shape index: {}]   ;;  %s6978_s1 = inlined_call_operand.vmem [shape: bf16[784,512], index: 1, kind: input, shape index: {}]   ;;  %s6979_s2 = inlined_call_operand.vmem [shape: f32[1,512], index: 2, kind: input, shape index: {}]   ;;  %s6980_s3 = inlined_call_operand.vmem [shape: bf16[512,128], index: 3, kind: input, shape index: {}]   ;;  %s6981_s4 = inlined_call_operand.vmem [shape: f32[1,128], index: 4, kind: input, shape index: {}]   ;;  %s6982_s5 = inlined_call_operand.vmem [shape: bf16[128,512], index: 5, kind: input, shape index: {}]   ;;  %s6983_s6 = inlined_call_operand.vmem [shape: f32[1,512], index: 6, kind: input, shape index: {}]   ;;  %s6984_s7 = inlined_call_operand.vmem [shape: bf16[512,784], index: 7, kind: input, shape index: {}]   ;;  %s6985_s8 = inlined_call_operand.vmem [shape: f32[1,784], index: 8, kind: input, shape index: {}]   ;;  %s6986_s9 = inlined_call_operand.hbm [shape: f32[8,784], index: 9, kind: output, shape index: {}]  }
   0x1   :  { %v4641_v0 = vld [vmem:[%s6978_s1 + $0x4] ss:$16 sps:$4 sm:$0xff]   ;;  %v4643_v1 = vld [vmem:[%s6978_s1 + $0xc] ss:$16 sps:$4 sm:$0xff]   ;;  %v4645_v2 = vld [vmem:[%s6978_s1] ss:$16 sps:$4 sm:$0xff]  }
   0x2   :  { %1250 = vmatprep.subr.bf16.mxu0 %v4641_v0  ;;  %v4646_v3 = vld [vmem:[%s6978_s1 + $0x8] ss:$16 sps:$4 sm:$0xff]   ;;  %1414 = vmatprep.subr.bf16.mxu1 %v4643_v1  ;;  %v4647_v4 = vld [vmem:[%s6978_s1 + $0x24] ss:$16 sps:$4 sm:$0xff]   ;;  %v4649_v5 = vld [vmem:[%s6978_s1 + $0x2c] ss:$16 sps:$4 sm:$0xff]  }
   0x3   :  { %1251 = vmatpush1.bf16.msra.mxu0 %v4645_v2  ;;  %1415 = vmatpush1.bf16.msra.mxu1 %v4646_v3  ;;  %v4651_v6 = vld [vmem:[%s6978_s1 + $0x20] ss:$16 sps:$4 sm:$0xff]   ;;  %v4652_v7 = vld [vmem:[%s6978_s1 + $0x28] ss:$16 sps:$4 sm:$0xff]   ;;  %v4653_v8 = vld [vmem:[%s6978_s1 + $0x44] ss:$16 sps:$4 sm:$0xff]  }
   0x4   :  { %1252 = vmatprep.subr.bf16.mxu0 %v4647_v4  ;;  %1416 = vmatprep.subr.bf16.mxu1 %v4649_v5  ;;  %v4655_v9 = vld [vmem:[%s6978_s1 + $0x4c] ss:$16 sps:$4 sm:$0xff]   ;;  %v4657_v10 = vld [vmem:[%s6978_s1 + $0x40] ss:$16 sps:$4 sm:$0xff]   ;;  %v4658_v11 = vld [vmem:[%s6978_s1 + $0x48] ss:$16 sps:$4 sm:$0xff]  }
   0x5   :  { %v4659_v12 = vld [vmem:[%s6978_s1 + $0x64] ss:$16 sps:$4 sm:$0xff]   ;;  %v4661_v13 = vld [vmem:[%s6978_s1 + $0x6c] ss:$16 sps:$4 sm:$0xff]   ;;  %v4663_v14 = vld [vmem:[%s6978_s1 + $0x60] ss:$16 sps:$4 sm:$0xff]  }
   0x6   :  { %v4664_v15 = vld [vmem:[%s6978_s1 + $0x68] ss:$16 sps:$4 sm:$0xff]   ;;  %v4665_v16 = vld [vmem:[%s6978_s1 + $0x84] ss:$16 sps:$4 sm:$0xff]   ;;  %v4667_v17 = vld [vmem:[%s6978_s1 + $0x8c] ss:$16 sps:$4 sm:$0xff]  }
   0x7   :  { %1253 = vmatpush1.bf16.msra.mxu0 %v4651_v6  ;;  %1417 = vmatpush1.bf16.msra.mxu1 %v4652_v7  ;;  %v4669_v18 = vld [vmem:[%s6978_s1 + $0x80] ss:$16 sps:$4 sm:$0xff]   ;;  %v4670_v19 = vld [vmem:[%s6978_s1 + $0x88] ss:$16 sps:$4 sm:$0xff]   ;;  %v4671_v20 = vld [vmem:[%s6978_s1 + $0xa4] ss:$16 sps:$4 sm:$0xff]  }
   0x8   :  { %1254 = vmatprep.subr.bf16.mxu0 %v4653_v8  ;;  %1418 = vmatprep.subr.bf16.mxu1 %v4655_v9  ;;  %v4673_v21 = vld [vmem:[%s6978_s1 + $0xac] ss:$16 sps:$4 sm:$0xff]   ;;  %v4675_v22 = vld [vmem:[%s6978_s1 + $0xa0] ss:$16 sps:$4 sm:$0xff]   ;;  %v4676_v23 = vld [vmem:[%s6978_s1 + $0xa8] ss:$16 sps:$4 sm:$0xff]  }
   0x9   :  { %v4677_v24 = vld [vmem:[%s6978_s1 + $0xc4] ss:$16 sps:$4 sm:$0xff]   ;;  %v4679_v25 = vld [vmem:[%s6978_s1 + $0xcc] ss:$16 sps:$4 sm:$0xff]   ;;  %v4681_v26 = vld [vmem:[%s6978_s1 + $0xc0] ss:$16 sps:$4 sm:$0xff]  }
   0xa   :  { %v4682_v27 = vld [vmem:[%s6978_s1 + $0xc8] ss:$16 sps:$4 sm:$0xff]   ;;  %v4683_v28 = vld [vmem:[%s6978_s1 + $0xe4] ss:$16 sps:$4 sm:$0xff]   ;;  %v4685_v29 = vld [vmem:[%s6978_s1 + $0xec] ss:$16 sps:$4 sm:$0xff]  }
   0xb   :  { %1255 = vmatpush1.bf16.msra.mxu0 %v4657_v10  ;;  %1419 = vmatpush1.bf16.msra.mxu1 %v4658_v11  ;;  %v4687_v30 = vld [vmem:[%s6978_s1 + $0xe0] ss:$16 sps:$4 sm:$0xff]   ;;  %v4688_v31 = vld [vmem:[%s6978_s1 + $0xe8] ss:$16 sps:$4 sm:$0xff]   ;;  %v4689_v32 = vld [vmem:[%s6978_s1 + $0x104] ss:$16 sps:$4 sm:$0xff]  }
   0xc   :  { %1256 = vmatprep.subr.bf16.mxu0 %v4659_v12  ;;  %1420 = vmatprep.subr.bf16.mxu1 %v4661_v13  ;;  %v4691_v33 = vld [vmem:[%s6978_s1 + $0x10c] ss:$16 sps:$4 sm:$0xff]   ;;  %v4693_v34 = vld [vmem:[%s6978_s1 + $0x100] ss:$16 sps:$4 sm:$0xff]   ;;  %v4694_v35 = vld [vmem:[%s6978_s1 + $0x108] ss:$16 sps:$4 sm:$0xff]  }
   0xd   :  { %v4695_v36 = vld [vmem:[%s6978_s1 + $0x124] ss:$16 sps:$4 sm:$0xff]   ;;  %v4697_v37 = vld [vmem:[%s6978_s1 + $0x12c] ss:$16 sps:$4 sm:$0xff]   ;;  %v4699_v38 = vld [vmem:[%s6978_s1 + $0x120] ss:$16 sps:$4 sm:$0xff]  }
   0xe   :  { %v4700_v39 = vld [vmem:[%s6978_s1 + $0x128] ss:$16 sps:$4 sm:$0xff]   ;;  %v4701_v40 = vld [vmem:[%s6978_s1 + $0x144] ss:$16 sps:$4 sm:$0xff]   ;;  %v4703_v41 = vld [vmem:[%s6978_s1 + $0x14c] ss:$16 sps:$4 sm:$0xff]  }
   0xf   :  { %1257 = vmatpush1.bf16.msra.mxu0 %v4663_v14  ;;  %1421 = vmatpush1.bf16.msra.mxu1 %v4664_v15  ;;  %v4705_v42 = vld [vmem:[%s6978_s1 + $0x140] ss:$16 sps:$4 sm:$0xff]   ;;  %v4706_v43 = vld [vmem:[%s6978_s1 + $0x148] ss:$16 sps:$4 sm:$0xff]   ;;  %v4707_v44 = vld [vmem:[%s6978_s1 + $0x164] ss:$16 sps:$4 sm:$0xff]  }
  0x10   :  { %1258 = vmatprep.subr.bf16.mxu0 %v4665_v16  ;;  %1422 = vmatprep.subr.bf16.mxu1 %v4667_v17  ;;  %v4709_v45 = vld [vmem:[%s6978_s1 + $0x16c] ss:$16 sps:$4 sm:$0xff]   ;;  %v4711_v47 = vld [vmem:[%s6978_s1 + $0x160] ss:$16 sps:$4 sm:$0xff]   ;;  %v4712_v49 = vld [vmem:[%s6978_s1 + $0x168] ss:$16 sps:$4 sm:$0xff]  }
  0x11   :  { %v35_v46 = vld [vmem:[%s6977_s0 + $0x8] sm:$0xff]  ;;  %v4713_v50 = vld [vmem:[%s6978_s1 + $0x184] ss:$16 sps:$4 sm:$0xff]   ;;  %v4717_v52 = vld [vmem:[%s6978_s1 + $0x180] ss:$16 sps:$4 sm:$0xff]  }
  0x12   :  { %v42_v48 = vpack.c.bf16 %v35_v46, %v35_v46  ;;  %v4715_v51 = vld [vmem:[%s6978_s1 + $0x18c] ss:$16 sps:$4 sm:$0xff]   ;;  %v4718_v53 = vld [vmem:[%s6978_s1 + $0x188] ss:$16 sps:$4 sm:$0xff]   ;;  %v4719_v54 = vld [vmem:[%s6978_s1 + $0x1a4] ss:$16 sps:$4 sm:$0xff]  }
  0x13   :  { %1259 = vmatpush1.bf16.msra.mxu0 %v4669_v18  ;;  %1423 = vmatpush1.bf16.msra.mxu1 %v4670_v19  ;;  %v4721_v55 = vld [vmem:[%s6978_s1 + $0x1ac] ss:$16 sps:$4 sm:$0xff]   ;;  %v4723_v56 = vld [vmem:[%s6978_s1 + $0x1a0] ss:$16 sps:$4 sm:$0xff]   ;;  %v4724_v57 = vld [vmem:[%s6978_s1 + $0x1a8] ss:$16 sps:$4 sm:$0xff]  }
  0x14   :  { %1260 = vmatprep.subr.bf16.mxu0 %v4671_v20  ;;  %1424 = vmatprep.subr.bf16.mxu1 %v4673_v21  ;;  %v4725_v58 = vld [vmem:[%s6978_s1 + $0x1c4] ss:$16 sps:$4 sm:$0xff]   ;;  %v4727_v59 = vld [vmem:[%s6978_s1 + $0x1cc] ss:$16 sps:$4 sm:$0xff]   ;;  %v4729_v60 = vld [vmem:[%s6978_s1 + $0x1c0] ss:$16 sps:$4 sm:$0xff]  }
  0x15   :  { %1282 = vmatprep.mubr.bf16.mxu0 %v42_v48  ;;  %1446 = vmatprep.mubr.bf16.mxu1 %v42_v48  ;;  %v4730_v61 = vld [vmem:[%s6978_s1 + $0x1c8] ss:$16 sps:$4 sm:$0xff]   ;;  %v4731_v62 = vld [vmem:[%s6978_s1 + $0x1e4] ss:$16 sps:$4 sm:$0xff]   ;;  %v4733_v63 = vld [vmem:[%s6978_s1 + $0x1ec] ss:$16 sps:$4 sm:$0xff]  }
  0x16   :  { %v4735_v0 = vld [vmem:[%s6978_s1 + $0x1e0] ss:$16 sps:$4 sm:$0xff]   ;;  %v4736_v1 = vld [vmem:[%s6978_s1 + $0x1e8] ss:$16 sps:$4 sm:$0xff]   ;;  %v4739_v3 = vld [vmem:[%s6978_s1 + $0x204] ss:$16 sps:$4 sm:$0xff]  }
  0x17   :  { %1261 = vmatpush1.bf16.msra.mxu0 %v4675_v22  ;;  %1425 = vmatpush1.bf16.msra.mxu1 %v4676_v23  ;;  %v34_v2 = vld [vmem:[%s6977_s0] sm:$0xff]  ;;  %v4742_v4 = vld [vmem:[%s6978_s1 + $0x20c] ss:$16 sps:$4 sm:$0xff]   ;;  %v4740_v7 = vld [vmem:[%s6978_s1 + $0x208] ss:$16 sps:$4 sm:$0xff]  }
  0x18   :  { %1262 = vmatprep.subr.bf16.mxu0 %v4677_v24  ;;  %1426 = vmatprep.subr.bf16.mxu1 %v4679_v25  ;;  %v41_v5 = vpack.c.bf16 %v34_v2, %v34_v2  ;;  %v4737_v6 = vld [vmem:[%s6978_s1 + $0x200] ss:$16 sps:$4 sm:$0xff]   ;;  %v4745_v8 = vld [vmem:[%s6978_s1 + $0x224] ss:$16 sps:$4 sm:$0xff]   ;;  %v4748_v9 = vld [vmem:[%s6978_s1 + $0x22c] ss:$16 sps:$4 sm:$0xff]  }
  0x19   :  { %v4743_v10 = vld [vmem:[%s6978_s1 + $0x220] ss:$16 sps:$4 sm:$0xff]   ;;  %v4746_v11 = vld [vmem:[%s6978_s1 + $0x228] ss:$16 sps:$4 sm:$0xff]   ;;  %v4751_v12 = vld [vmem:[%s6978_s1 + $0x244] ss:$16 sps:$4 sm:$0xff]  }
  0x1a   :  { %v4754_v13 = vld [vmem:[%s6978_s1 + $0x24c] ss:$16 sps:$4 sm:$0xff]   ;;  %v4749_v14 = vld [vmem:[%s6978_s1 + $0x240] ss:$16 sps:$4 sm:$0xff]   ;;  %v4752_v15 = vld [vmem:[%s6978_s1 + $0x248] ss:$16 sps:$4 sm:$0xff]  }
  0x1b   :  { %1263 = vmatpush1.bf16.msra.mxu0 %v4681_v26  ;;  %1427 = vmatpush1.bf16.msra.mxu1 %v4682_v27  ;;  %v4757_v16 = vld [vmem:[%s6978_s1 + $0x264] ss:$16 sps:$4 sm:$0xff]   ;;  %v4760_v17 = vld [vmem:[%s6978_s1 + $0x26c] ss:$16 sps:$4 sm:$0xff]   ;;  %v4755_v18 = vld [vmem:[%s6978_s1 + $0x260] ss:$16 sps:$4 sm:$0xff]  }
  0x1c   :  { %1264 = vmatprep.subr.bf16.mxu0 %v4683_v28  ;;  %1428 = vmatprep.subr.bf16.mxu1 %v4685_v29  ;;  %v4758_v19 = vld [vmem:[%s6978_s1 + $0x268] ss:$16 sps:$4 sm:$0xff]   ;;  %v4763_v20 = vld [vmem:[%s6978_s1 + $0x284] ss:$16 sps:$4 sm:$0xff]   ;;  %v4766_v21 = vld [vmem:[%s6978_s1 + $0x28c] ss:$16 sps:$4 sm:$0xff]  }
  0x1d   :  { %v4761_v22 = vld [vmem:[%s6978_s1 + $0x280] ss:$16 sps:$4 sm:$0xff]   ;;  %v4764_v23 = vld [vmem:[%s6978_s1 + $0x288] ss:$16 sps:$4 sm:$0xff]   ;;  %v4769_v24 = vld [vmem:[%s6978_s1 + $0x2a4] ss:$16 sps:$4 sm:$0xff]  }
  0x1e   :  { %v4772_v25 = vld [vmem:[%s6978_s1 + $0x2ac] ss:$16 sps:$4 sm:$0xff]   ;;  %v4767_v26 = vld [vmem:[%s6978_s1 + $0x2a0] ss:$16 sps:$4 sm:$0xff]   ;;  %v4770_v27 = vld [vmem:[%s6978_s1 + $0x2a8] ss:$16 sps:$4 sm:$0xff]  }
  0x1f   :  { %1265 = vmatpush1.bf16.msra.mxu0 %v4687_v30  ;;  %1429 = vmatpush1.bf16.msra.mxu1 %v4688_v31  ;;  %v4775_v28 = vld [vmem:[%s6978_s1 + $0x2c4] ss:$16 sps:$4 sm:$0xff]   ;;  %v4778_v29 = vld [vmem:[%s6978_s1 + $0x2cc] ss:$16 sps:$4 sm:$0xff]   ;;  %v4773_v31 = vld [vmem:[%s6978_s1 + $0x2c0] ss:$16 sps:$4 sm:$0xff]  }
  0x20   :  { %1266 = vmatprep.subr.bf16.mxu0 %v4689_v32  ;;  %1430 = vmatprep.subr.bf16.mxu1 %v4691_v33  ;;  %v37_v30 = vld [vmem:[%s6977_s0 + $0x18] sm:$0xff]  ;;  %v4799_v46 = vld [vmem:[%s6978_s1 + $0x344] ss:$16 sps:$4 sm:$0xff]   ;;  %v4797_v48 = vld [vmem:[%s6978_s1 + $0x340] ss:$16 sps:$4 sm:$0xff]  }
  0x21   :  { %v44_v32 = vpack.c.bf16 %v37_v30, %v37_v30  ;;  %v4776_v33 = vld [vmem:[%s6978_s1 + $0x2c8] ss:$16 sps:$4 sm:$0xff]   ;;  %v4829_v2 = vld [vmem:[%s6978_s1 + $0x3e4] ss:$16 sps:$4 sm:$0xff]  }
  0x22   :  { %v4865_v30 = vld [vmem:[%s6978_s1 + $0x4a4] ss:$16 sps:$4 sm:$0xff]  }
  0x23   :  { %1267 = vmatpush1.bf16.msra.mxu0 %v4693_v34  ;;  %1431 = vmatpush1.bf16.msra.mxu1 %v4694_v35  ;;  %v4781_v34 = vld [vmem:[%s6978_s1 + $0x2e4] ss:$16 sps:$4 sm:$0xff]   ;;  %v4784_v35 = vld [vmem:[%s6978_s1 + $0x2ec] ss:$16 sps:$4 sm:$0xff]  }
  0x24   :  { %1268 = vmatprep.subr.bf16.mxu0 %v4695_v36  ;;  %1432 = vmatprep.subr.bf16.mxu1 %v4697_v37  ;;  %v4779_v36 = vld [vmem:[%s6978_s1 + $0x2e0] ss:$16 sps:$4 sm:$0xff]   ;;  %v4782_v37 = vld [vmem:[%s6978_s1 + $0x2e8] ss:$16 sps:$4 sm:$0xff]  }
  0x27   :  { %1269 = vmatpush1.bf16.msra.mxu0 %v4699_v38  ;;  %1433 = vmatpush1.bf16.msra.mxu1 %v4700_v39  ;;  %v4787_v38 = vld [vmem:[%s6978_s1 + $0x304] ss:$16 sps:$4 sm:$0xff]   ;;  %v4790_v39 = vld [vmem:[%s6978_s1 + $0x30c] ss:$16 sps:$4 sm:$0xff]  }
  0x28   :  { %1270 = vmatprep.subr.bf16.mxu0 %v4701_v40  ;;  %1434 = vmatprep.subr.bf16.mxu1 %v4703_v41  ;;  %v4785_v40 = vld [vmem:[%s6978_s1 + $0x300] ss:$16 sps:$4 sm:$0xff]   ;;  %v4788_v41 = vld [vmem:[%s6978_s1 + $0x308] ss:$16 sps:$4 sm:$0xff]  }
  0x2b   :  { %1271 = vmatpush1.bf16.msra.mxu0 %v4705_v42  ;;  %1435 = vmatpush1.bf16.msra.mxu1 %v4706_v43  ;;  %v4793_v42 = vld [vmem:[%s6978_s1 + $0x324] ss:$16 sps:$4 sm:$0xff]   ;;  %v4796_v43 = vld [vmem:[%s6978_s1 + $0x32c] ss:$16 sps:$4 sm:$0xff]  }
  0x2c   :  { %1272 = vmatprep.subr.bf16.mxu0 %v4707_v44  ;;  %1436 = vmatprep.subr.bf16.mxu1 %v4709_v45  ;;  %v4791_v44 = vld [vmem:[%s6978_s1 + $0x320] ss:$16 sps:$4 sm:$0xff]   ;;  %v4794_v45 = vld [vmem:[%s6978_s1 + $0x328] ss:$16 sps:$4 sm:$0xff]  }
  0x2f   :  { %1273 = vmatpush1.bf16.msra.mxu0 %v4711_v47  ;;  %1437 = vmatpush1.bf16.msra.mxu1 %v4712_v49  ;;  %v4802_v47 = vld [vmem:[%s6978_s1 + $0x34c] ss:$16 sps:$4 sm:$0xff]   ;;  %v4800_v49 = vld [vmem:[%s6978_s1 + $0x348] ss:$16 sps:$4 sm:$0xff]  }
  0x30   :  { %1274 = vmatprep.subr.bf16.mxu0 %v4713_v50  ;;  %1438 = vmatprep.subr.bf16.mxu1 %v4715_v51  ;;  %v4805_v50 = vld [vmem:[%s6978_s1 + $0x364] ss:$16 sps:$4 sm:$0xff]   ;;  %v4808_v51 = vld [vmem:[%s6978_s1 + $0x36c] ss:$16 sps:$4 sm:$0xff]  }
  0x33   :  { %1275 = vmatpush1.bf16.msra.mxu0 %v4717_v52  ;;  %1439 = vmatpush1.bf16.msra.mxu1 %v4718_v53  ;;  %v4803_v52 = vld [vmem:[%s6978_s1 + $0x360] ss:$16 sps:$4 sm:$0xff]   ;;  %v4806_v53 = vld [vmem:[%s6978_s1 + $0x368] ss:$16 sps:$4 sm:$0xff]  }
  0x34   :  { %1276 = vmatprep.subr.bf16.mxu0 %v4719_v54  ;;  %1440 = vmatprep.subr.bf16.mxu1 %v4721_v55  ;;  %v4811_v54 = vld [vmem:[%s6978_s1 + $0x384] ss:$16 sps:$4 sm:$0xff]   ;;  %v4814_v55 = vld [vmem:[%s6978_s1 + $0x38c] ss:$16 sps:$4 sm:$0xff]  }
  0x37   :  { %1277 = vmatpush1.bf16.msra.mxu0 %v4723_v56  ;;  %1441 = vmatpush1.bf16.msra.mxu1 %v4724_v57  ;;  %v4809_v56 = vld [vmem:[%s6978_s1 + $0x380] ss:$16 sps:$4 sm:$0xff]   ;;  %v4812_v57 = vld [vmem:[%s6978_s1 + $0x388] ss:$16 sps:$4 sm:$0xff]  }
  0x38   :  { %1278 = vmatprep.subr.bf16.mxu0 %v4725_v58  ;;  %1442 = vmatprep.subr.bf16.mxu1 %v4727_v59  ;;  %v4817_v58 = vld [vmem:[%s6978_s1 + $0x3a4] ss:$16 sps:$4 sm:$0xff]   ;;  %v4820_v59 = vld [vmem:[%s6978_s1 + $0x3ac] ss:$16 sps:$4 sm:$0xff]  }
  0x3b   :  { %1279 = vmatpush1.bf16.msra.mxu0 %v4729_v60  ;;  %1443 = vmatpush1.bf16.msra.mxu1 %v4730_v61  ;;  %v4815_v60 = vld [vmem:[%s6978_s1 + $0x3a0] ss:$16 sps:$4 sm:$0xff]   ;;  %v4818_v61 = vld [vmem:[%s6978_s1 + $0x3a8] ss:$16 sps:$4 sm:$0xff]  }
  0x3c   :  { %1280 = vmatprep.subr.bf16.mxu0 %v4731_v62  ;;  %1444 = vmatprep.subr.bf16.mxu1 %v4733_v63  ;;  %v4823_v62 = vld [vmem:[%s6978_s1 + $0x3c4] ss:$16 sps:$4 sm:$0xff]   ;;  %v4826_v63 = vld [vmem:[%s6978_s1 + $0x3cc] ss:$16 sps:$4 sm:$0xff]  }
  0x3f   :  { %1281 = vmatpush1.bf16.msra.mxu0 %v4735_v0  ;;  %1445 = vmatpush1.bf16.msra.mxu1 %v4736_v1  ;;  %v4821_v0 = vld [vmem:[%s6978_s1 + $0x3c0] ss:$16 sps:$4 sm:$0xff]   ;;  %v4824_v1 = vld [vmem:[%s6978_s1 + $0x3c8] ss:$16 sps:$4 sm:$0xff]  }
  0x40   :  { %1291 = vmatprep.subr.bf16.mxu0 %v4739_v3  ;;  %1455 = vmatprep.subr.bf16.mxu1 %v4742_v4  ;;  %v4832_v3 = vld [vmem:[%s6978_s1 + $0x3ec] ss:$16 sps:$4 sm:$0xff]   ;;  %v4827_v4 = vld [vmem:[%s6978_s1 + $0x3e0] ss:$16 sps:$4 sm:$0xff]  }
  0x42   :  { %1283 = vmatmul.mubr.bf16.vlgmr.msra.gmra.mrb[0].mxu0 %v41_v5  ;;  %1447 = vmatmul.mubr.bf16.vlgmr.msra.gmra.mrb[0].mxu1 %v41_v5  ;;  %v4830_v5 = vld [vmem:[%s6978_s1 + $0x3e8] ss:$16 sps:$4 sm:$0xff]  }
  0x43   :  { %1292 = vmatpush1.bf16.msra.mxu0 %v4737_v6  ;;  %1456 = vmatpush1.bf16.msra.mxu1 %v4740_v7  ;;  %v4835_v6 = vld [vmem:[%s6978_s1 + $0x404] ss:$16 sps:$4 sm:$0xff]  }
  0x44   :  { %1293 = vmatprep.subr.bf16.mxu0 %v4745_v8  ;;  %1457 = vmatprep.subr.bf16.mxu1 %v4748_v9  ;;  %v36_v7 = vld [vmem:[%s6977_s0 + $0x10] sm:$0xff]  ;;  %v4838_v8 = vld [vmem:[%s6978_s1 + $0x40c] ss:$16 sps:$4 sm:$0xff]  }
  0x45   :  { %1323 = vmatprep.mubr.bf16.mxu0 %v44_v32  ;;  %1487 = vmatprep.mubr.bf16.mxu1 %v44_v32  ;;  %v4833_v9 = vld [vmem:[%s6978_s1 + $0x400] ss:$16 sps:$4 sm:$0xff]  }
  0x46   :  { %v4863_v32 = vld [vmem:[%s6978_s1 + $0x4a0] ss:$16 sps:$4 sm:$0xff]  }
  0x47   :  { %1294 = vmatpush1.bf16.msra.mxu0 %v4743_v10  ;;  %1458 = vmatpush1.bf16.msra.mxu1 %v4746_v11  ;;  %v43_v10 = vpack.c.bf16 %v36_v7, %v36_v7  ;;  %v4836_v11 = vld [vmem:[%s6978_s1 + $0x408] ss:$16 sps:$4 sm:$0xff]   ;;  %v4928_v7 = vld [vmem:[%s6978_s1 + $0x5ec] ss:$16 sps:$4 sm:$0xff]  }
  0x48   :  { %1295 = vmatprep.subr.bf16.mxu0 %v4751_v12  ;;  %1459 = vmatprep.subr.bf16.mxu1 %v4754_v13  ;;  %v4841_v12 = vld [vmem:[%s6978_s1 + $0x424] ss:$16 sps:$4 sm:$0xff]   ;;  %v4844_v13 = vld [vmem:[%s6978_s1 + $0x42c] ss:$16 sps:$4 sm:$0xff]  }
  0x4b   :  { %1296 = vmatpush1.bf16.msra.mxu0 %v4749_v14  ;;  %1460 = vmatpush1.bf16.msra.mxu1 %v4752_v15  ;;  %v39_v14 = vld [vmem:[%s6977_s0 + $0x28] sm:$0xff] }
  0x4c   :  { %1297 = vmatprep.subr.bf16.mxu0 %v4757_v16  ;;  %1461 = vmatprep.subr.bf16.mxu1 %v4760_v17  ;;  %v46_v15 = vpack.c.bf16 %v39_v14, %v39_v14  ;;  %v4839_v16 = vld [vmem:[%s6978_s1 + $0x420] ss:$16 sps:$4 sm:$0xff]   ;;  %v4842_v17 = vld [vmem:[%s6978_s1 + $0x428] ss:$16 sps:$4 sm:$0xff]  }
  0x4d   :  { %v4932_v14 = vld [vmem:[%s6978_s1 + $0x608] ss:$16 sps:$4 sm:$0xff]  }
  0x4f   :  { %1298 = vmatpush1.bf16.msra.mxu0 %v4755_v18  ;;  %1462 = vmatpush1.bf16.msra.mxu1 %v4758_v19  ;;  %v4847_v18 = vld [vmem:[%s6978_s1 + $0x444] ss:$16 sps:$4 sm:$0xff]   ;;  %v4850_v19 = vld [vmem:[%s6978_s1 + $0x44c] ss:$16 sps:$4 sm:$0xff]  }
  0x50   :  { %1299 = vmatprep.subr.bf16.mxu0 %v4763_v20  ;;  %1463 = vmatprep.subr.bf16.mxu1 %v4766_v21  ;;  %v4845_v20 = vld [vmem:[%s6978_s1 + $0x440] ss:$16 sps:$4 sm:$0xff]   ;;  %v4848_v21 = vld [vmem:[%s6978_s1 + $0x448] ss:$16 sps:$4 sm:$0xff]  }
  0x53   :  { %1300 = vmatpush1.bf16.msra.mxu0 %v4761_v22  ;;  %1464 = vmatpush1.bf16.msra.mxu1 %v4764_v23  ;;  %v4853_v22 = vld [vmem:[%s6978_s1 + $0x464] ss:$16 sps:$4 sm:$0xff]   ;;  %v4856_v23 = vld [vmem:[%s6978_s1 + $0x46c] ss:$16 sps:$4 sm:$0xff]  }
  0x54   :  { %1301 = vmatprep.subr.bf16.mxu0 %v4769_v24  ;;  %1465 = vmatprep.subr.bf16.mxu1 %v4772_v25  ;;  %v4851_v24 = vld [vmem:[%s6978_s1 + $0x460] ss:$16 sps:$4 sm:$0xff]   ;;  %v4854_v25 = vld [vmem:[%s6978_s1 + $0x468] ss:$16 sps:$4 sm:$0xff]  }
  0x57   :  { %1302 = vmatpush1.bf16.msra.mxu0 %v4767_v26  ;;  %1466 = vmatpush1.bf16.msra.mxu1 %v4770_v27  ;;  %v4859_v26 = vld [vmem:[%s6978_s1 + $0x484] ss:$16 sps:$4 sm:$0xff]   ;;  %v4862_v27 = vld [vmem:[%s6978_s1 + $0x48c] ss:$16 sps:$4 sm:$0xff]  }
  0x58   :  { %1303 = vmatprep.subr.bf16.mxu0 %v4775_v28  ;;  %1467 = vmatprep.subr.bf16.mxu1 %v4778_v29  ;;  %v4857_v28 = vld [vmem:[%s6978_s1 + $0x480] ss:$16 sps:$4 sm:$0xff]   ;;  %v4860_v29 = vld [vmem:[%s6978_s1 + $0x488] ss:$16 sps:$4 sm:$0xff]  }
  0x5b   :  { %1304 = vmatpush1.bf16.msra.mxu0 %v4773_v31  ;;  %1468 = vmatpush1.bf16.msra.mxu1 %v4776_v33  ;;  %v4868_v31 = vld [vmem:[%s6978_s1 + $0x4ac] ss:$16 sps:$4 sm:$0xff]   ;;  %v4866_v33 = vld [vmem:[%s6978_s1 + $0x4a8] ss:$16 sps:$4 sm:$0xff]  }
  0x5c   :  { %1305 = vmatprep.subr.bf16.mxu0 %v4781_v34  ;;  %1469 = vmatprep.subr.bf16.mxu1 %v4784_v35  ;;  %v4871_v34 = vld [vmem:[%s6978_s1 + $0x4c4] ss:$16 sps:$4 sm:$0xff]   ;;  %v4874_v35 = vld [vmem:[%s6978_s1 + $0x4cc] ss:$16 sps:$4 sm:$0xff]  }
  0x5f   :  { %1306 = vmatpush1.bf16.msra.mxu0 %v4779_v36  ;;  %1470 = vmatpush1.bf16.msra.mxu1 %v4782_v37  ;;  %v4869_v36 = vld [vmem:[%s6978_s1 + $0x4c0] ss:$16 sps:$4 sm:$0xff]   ;;  %v4872_v37 = vld [vmem:[%s6978_s1 + $0x4c8] ss:$16 sps:$4 sm:$0xff]  }
  0x60   :  { %1307 = vmatprep.subr.bf16.mxu0 %v4787_v38  ;;  %1471 = vmatprep.subr.bf16.mxu1 %v4790_v39  ;;  %v4877_v38 = vld [vmem:[%s6978_s1 + $0x4e4] ss:$16 sps:$4 sm:$0xff]   ;;  %v4880_v39 = vld [vmem:[%s6978_s1 + $0x4ec] ss:$16 sps:$4 sm:$0xff]  }
  0x63   :  { %1308 = vmatpush1.bf16.msra.mxu0 %v4785_v40  ;;  %1472 = vmatpush1.bf16.msra.mxu1 %v4788_v41  ;;  %v4875_v40 = vld [vmem:[%s6978_s1 + $0x4e0] ss:$16 sps:$4 sm:$0xff]   ;;  %v4878_v41 = vld [vmem:[%s6978_s1 + $0x4e8] ss:$16 sps:$4 sm:$0xff]  }
  0x64   :  { %1309 = vmatprep.subr.bf16.mxu0 %v4793_v42  ;;  %1473 = vmatprep.subr.bf16.mxu1 %v4796_v43  ;;  %v4883_v42 = vld [vmem:[%s6978_s1 + $0x504] ss:$16 sps:$4 sm:$0xff]   ;;  %v4886_v43 = vld [vmem:[%s6978_s1 + $0x50c] ss:$16 sps:$4 sm:$0xff]  }
  0x67   :  { %1310 = vmatpush1.bf16.msra.mxu0 %v4791_v44  ;;  %1474 = vmatpush1.bf16.msra.mxu1 %v4794_v45  ;;  %v4881_v44 = vld [vmem:[%s6978_s1 + $0x500] ss:$16 sps:$4 sm:$0xff]   ;;  %v4884_v45 = vld [vmem:[%s6978_s1 + $0x508] ss:$16 sps:$4 sm:$0xff]  }
  0x68   :  { %1311 = vmatprep.subr.bf16.mxu0 %v4799_v46  ;;  %1475 = vmatprep.subr.bf16.mxu1 %v4802_v47  ;;  %v4889_v46 = vld [vmem:[%s6978_s1 + $0x524] ss:$16 sps:$4 sm:$0xff]   ;;  %v4892_v47 = vld [vmem:[%s6978_s1 + $0x52c] ss:$16 sps:$4 sm:$0xff]  }
  0x6b   :  { %1312 = vmatpush1.bf16.msra.mxu0 %v4797_v48  ;;  %1476 = vmatpush1.bf16.msra.mxu1 %v4800_v49  ;;  %v4887_v48 = vld [vmem:[%s6978_s1 + $0x520] ss:$16 sps:$4 sm:$0xff]   ;;  %v4890_v49 = vld [vmem:[%s6978_s1 + $0x528] ss:$16 sps:$4 sm:$0xff]  }
  0x6c   :  { %1313 = vmatprep.subr.bf16.mxu0 %v4805_v50  ;;  %1477 = vmatprep.subr.bf16.mxu1 %v4808_v51  ;;  %v4895_v50 = vld [vmem:[%s6978_s1 + $0x544] ss:$16 sps:$4 sm:$0xff]   ;;  %v4898_v51 = vld [vmem:[%s6978_s1 + $0x54c] ss:$16 sps:$4 sm:$0xff]  }
  0x6f   :  { %1314 = vmatpush1.bf16.msra.mxu0 %v4803_v52  ;;  %1478 = vmatpush1.bf16.msra.mxu1 %v4806_v53  ;;  %v4893_v52 = vld [vmem:[%s6978_s1 + $0x540] ss:$16 sps:$4 sm:$0xff]   ;;  %v4896_v53 = vld [vmem:[%s6978_s1 + $0x548] ss:$16 sps:$4 sm:$0xff]  }
  0x70   :  { %1315 = vmatprep.subr.bf16.mxu0 %v4811_v54  ;;  %1479 = vmatprep.subr.bf16.mxu1 %v4814_v55  ;;  %v4901_v54 = vld [vmem:[%s6978_s1 + $0x564] ss:$16 sps:$4 sm:$0xff]   ;;  %v4904_v55 = vld [vmem:[%s6978_s1 + $0x56c] ss:$16 sps:$4 sm:$0xff]  }
  0x73   :  { %1316 = vmatpush1.bf16.msra.mxu0 %v4809_v56  ;;  %1480 = vmatpush1.bf16.msra.mxu1 %v4812_v57  ;;  %v4899_v56 = vld [vmem:[%s6978_s1 + $0x560] ss:$16 sps:$4 sm:$0xff]   ;;  %v4902_v57 = vld [vmem:[%s6978_s1 + $0x568] ss:$16 sps:$4 sm:$0xff]  }
  0x74   :  { %1317 = vmatprep.subr.bf16.mxu0 %v4817_v58  ;;  %1481 = vmatprep.subr.bf16.mxu1 %v4820_v59  ;;  %v4907_v58 = vld [vmem:[%s6978_s1 + $0x584] ss:$16 sps:$4 sm:$0xff]   ;;  %v4910_v59 = vld [vmem:[%s6978_s1 + $0x58c] ss:$16 sps:$4 sm:$0xff]  }
  0x77   :  { %1318 = vmatpush1.bf16.msra.mxu0 %v4815_v60  ;;  %1482 = vmatpush1.bf16.msra.mxu1 %v4818_v61  ;;  %v4905_v60 = vld [vmem:[%s6978_s1 + $0x580] ss:$16 sps:$4 sm:$0xff]   ;;  %v4908_v61 = vld [vmem:[%s6978_s1 + $0x588] ss:$16 sps:$4 sm:$0xff]  }
  0x78   :  { %1319 = vmatprep.subr.bf16.mxu0 %v4823_v62  ;;  %1483 = vmatprep.subr.bf16.mxu1 %v4826_v63  ;;  %v4913_v62 = vld [vmem:[%s6978_s1 + $0x5a4] ss:$16 sps:$4 sm:$0xff]   ;;  %v4916_v63 = vld [vmem:[%s6978_s1 + $0x5ac] ss:$16 sps:$4 sm:$0xff]  }
  0x7b   :  { %1320 = vmatpush1.bf16.msra.mxu0 %v4821_v0  ;;  %1484 = vmatpush1.bf16.msra.mxu1 %v4824_v1  ;;  %v4911_v0 = vld [vmem:[%s6978_s1 + $0x5a0] ss:$16 sps:$4 sm:$0xff]   ;;  %v4914_v1 = vld [vmem:[%s6978_s1 + $0x5a8] ss:$16 sps:$4 sm:$0xff]  }
  0x7c   :  { %1321 = vmatprep.subr.bf16.mxu0 %v4829_v2  ;;  %1485 = vmatprep.subr.bf16.mxu1 %v4832_v3  ;;  %v4919_v2 = vld [vmem:[%s6978_s1 + $0x5c4] ss:$16 sps:$4 sm:$0xff]   ;;  %v4922_v3 = vld [vmem:[%s6978_s1 + $0x5cc] ss:$16 sps:$4 sm:$0xff]  }
  0x7f   :  { %1322 = vmatpush1.bf16.msra.mxu0 %v4827_v4  ;;  %1486 = vmatpush1.bf16.msra.mxu1 %v4830_v5  ;;  %v4917_v4 = vld [vmem:[%s6978_s1 + $0x5c0] ss:$16 sps:$4 sm:$0xff]   ;;  %v4920_v5 = vld [vmem:[%s6978_s1 + $0x5c8] ss:$16 sps:$4 sm:$0xff]  }
  0x80   :  { %1332 = vmatprep.subr.bf16.mxu0 %v4835_v6  ;;  %1496 = vmatprep.subr.bf16.mxu1 %v4838_v8  ;;  %v4925_v6 = vld [vmem:[%s6978_s1 + $0x5e4] ss:$16 sps:$4 sm:$0xff]   ;;  %v4923_v8 = vld [vmem:[%s6978_s1 + $0x5e0] ss:$16 sps:$4 sm:$0xff]  }
  0x82   :  { %1324 = vmatmul.mubr.bf16.vlgmr.msra.gmra.mrb[0].mxu0 %v43_v10  ;;  %1488 = vmatmul.mubr.bf16.vlgmr.msra.gmra.mrb[0].mxu1 %v43_v10  ;;  %v38_v10 = vld [vmem:[%s6977_s0 + $0x20] sm:$0xff] }
  0x83   :  { %1333 = vmatpush1.bf16.msra.mxu0 %v4833_v9  ;;  %1497 = vmatpush1.bf16.msra.mxu1 %v4836_v11  ;;  %v4926_v9 = vld [vmem:[%s6978_s1 + $0x5e8] ss:$16 sps:$4 sm:$0xff]   ;;  %v4931_v11 = vld [vmem:[%s6978_s1 + $0x604] ss:$16 sps:$4 sm:$0xff]  }
  0x84   :  { %1334 = vmatprep.subr.bf16.mxu0 %v4841_v12  ;;  %1498 = vmatprep.subr.bf16.mxu1 %v4844_v13  ;;  %v4934_v12 = vld [vmem:[%s6978_s1 + $0x60c] ss:$16 sps:$4 sm:$0xff]   ;;  %v4929_v13 = vld [vmem:[%s6978_s1 + $0x600] ss:$16 sps:$4 sm:$0xff]  }
  0x85   :  { %1364 = vmatprep.mubr.bf16.mxu0 %v46_v15  ;;  %1528 = vmatprep.mubr.bf16.mxu1 %v46_v15  ;;  %v45_v15 = vpack.c.bf16 %v38_v10, %v38_v10 }
  0x87   :  { %1335 = vmatpush1.bf16.msra.mxu0 %v4839_v16  ;;  %1499 = vmatpush1.bf16.msra.mxu1 %v4842_v17  ;;  %v4935_v16 = vld [vmem:[%s6980_s3 + $0x40] sm:$0xff]   ;;  %v5359_v17 = vmov 0  }
  0x88   :  { %1336 = vmatprep.subr.bf16.mxu0 %v4847_v18  ;;  %1500 = vmatprep.subr.bf16.mxu1 %v4850_v19  ;;  %v40_v18 = vld [vmem:[%s6977_s0 + $0x30] sm:$0xff]  ;;  %v4936_v19 = vld [vmem:[%s6980_s3] sm:$0xff]  }
  0x8b   :  { %1337 = vmatpush1.bf16.msra.mxu0 %v4845_v20  ;;  %1501 = vmatpush1.bf16.msra.mxu1 %v4848_v21  ;;  %v47_v20 = vpack.c.bf16 %v40_v18, %v40_v18  ;;  %v4937_v21 = vld [vmem:[%s6980_s3 + $0x48] sm:$0xff]  }
  0x8c   :  { %1338 = vmatprep.subr.bf16.mxu0 %v4853_v22  ;;  %1502 = vmatprep.subr.bf16.mxu1 %v4856_v23  ;;  %v4938_v22 = vld [vmem:[%s6980_s3 + $0x8] sm:$0xff]   ;;  %v4939_v23 = vld [vmem:[%s6980_s3 + $0x50] sm:$0xff]  }
  0x8f   :  { %1339 = vmatpush1.bf16.msra.mxu0 %v4851_v24  ;;  %1503 = vmatpush1.bf16.msra.mxu1 %v4854_v25  ;;  %v4940_v24 = vld [vmem:[%s6980_s3 + $0x10] sm:$0xff]   ;;  %v4941_v25 = vld [vmem:[%s6980_s3 + $0x58] sm:$0xff]  }
  0x90   :  { %1340 = vmatprep.subr.bf16.mxu0 %v4859_v26  ;;  %1504 = vmatprep.subr.bf16.mxu1 %v4862_v27  ;;  %v4942_v26 = vld [vmem:[%s6980_s3 + $0x18] sm:$0xff]   ;;  %v4943_v27 = vld [vmem:[%s6980_s3 + $0x60] sm:$0xff]  }
  0x93   :  { %1341 = vmatpush1.bf16.msra.mxu0 %v4857_v28  ;;  %1505 = vmatpush1.bf16.msra.mxu1 %v4860_v29  ;;  %v4944_v28 = vld [vmem:[%s6980_s3 + $0x20] sm:$0xff]   ;;  %v4945_v29 = vld [vmem:[%s6980_s3 + $0x68] sm:$0xff]  }
  0x94   :  { %1342 = vmatprep.subr.bf16.mxu0 %v4865_v30  ;;  %1506 = vmatprep.subr.bf16.mxu1 %v4868_v31  ;;  %v4946_v30 = vld [vmem:[%s6980_s3 + $0x28] sm:$0xff]   ;;  %v4947_v31 = vld [vmem:[%s6980_s3 + $0x70] sm:$0xff]  }
  0x97   :  { %1343 = vmatpush1.bf16.msra.mxu0 %v4863_v32  ;;  %1507 = vmatpush1.bf16.msra.mxu1 %v4866_v33  ;;  %v4948_v32 = vld [vmem:[%s6980_s3 + $0x30] sm:$0xff]  }
  0x98   :  { %1344 = vmatprep.subr.bf16.mxu0 %v4871_v34  ;;  %1508 = vmatprep.subr.bf16.mxu1 %v4874_v35 }
  0x9b   :  { %1345 = vmatpush1.bf16.msra.mxu0 %v4869_v36  ;;  %1509 = vmatpush1.bf16.msra.mxu1 %v4872_v37 }
  0x9c   :  { %1346 = vmatprep.subr.bf16.mxu0 %v4877_v38  ;;  %1510 = vmatprep.subr.bf16.mxu1 %v4880_v39 }
  0x9f   :  { %1347 = vmatpush1.bf16.msra.mxu0 %v4875_v40  ;;  %1511 = vmatpush1.bf16.msra.mxu1 %v4878_v41 }
  0xa0   :  { %1348 = vmatprep.subr.bf16.mxu0 %v4883_v42  ;;  %1512 = vmatprep.subr.bf16.mxu1 %v4886_v43 }
  0xa3   :  { %1349 = vmatpush1.bf16.msra.mxu0 %v4881_v44  ;;  %1513 = vmatpush1.bf16.msra.mxu1 %v4884_v45 }
  0xa4   :  { %1350 = vmatprep.subr.bf16.mxu0 %v4889_v46  ;;  %1514 = vmatprep.subr.bf16.mxu1 %v4892_v47 }
  0xa7   :  { %1351 = vmatpush1.bf16.msra.mxu0 %v4887_v48  ;;  %1515 = vmatpush1.bf16.msra.mxu1 %v4890_v49 }
  0xa8   :  { %1352 = vmatprep.subr.bf16.mxu0 %v4895_v50  ;;  %1516 = vmatprep.subr.bf16.mxu1 %v4898_v51 }
  0xab   :  { %1353 = vmatpush1.bf16.msra.mxu0 %v4893_v52  ;;  %1517 = vmatpush1.bf16.msra.mxu1 %v4896_v53 }
  0xac   :  { %1354 = vmatprep.subr.bf16.mxu0 %v4901_v54  ;;  %1518 = vmatprep.subr.bf16.mxu1 %v4904_v55 }
  0xaf   :  { %1355 = vmatpush1.bf16.msra.mxu0 %v4899_v56  ;;  %1519 = vmatpush1.bf16.msra.mxu1 %v4902_v57 }
  0xb0   :  { %1356 = vmatprep.subr.bf16.mxu0 %v4907_v58  ;;  %1520 = vmatprep.subr.bf16.mxu1 %v4910_v59 }
  0xb3   :  { %1357 = vmatpush1.bf16.msra.mxu0 %v4905_v60  ;;  %1521 = vmatpush1.bf16.msra.mxu1 %v4908_v61 }
  0xb4   :  { %1358 = vmatprep.subr.bf16.mxu0 %v4913_v62  ;;  %1522 = vmatprep.subr.bf16.mxu1 %v4916_v63 }
  0xb7   :  { %1359 = vmatpush1.bf16.msra.mxu0 %v4911_v0  ;;  %1523 = vmatpush1.bf16.msra.mxu1 %v4914_v1 }
  0xb8   :  { %1360 = vmatprep.subr.bf16.mxu0 %v4919_v2  ;;  %1524 = vmatprep.subr.bf16.mxu1 %v4922_v3 }
  0xbb   :  { %1361 = vmatpush1.bf16.msra.mxu0 %v4917_v4  ;;  %1525 = vmatpush1.bf16.msra.mxu1 %v4920_v5 }
  0xbc   :  { %1362 = vmatprep.subr.bf16.mxu0 %v4925_v6  ;;  %1526 = vmatprep.subr.bf16.mxu1 %v4928_v7 }
  0xbf   :  { %1363 = vmatpush1.bf16.msra.mxu0 %v4923_v8  ;;  %1527 = vmatpush1.bf16.msra.mxu1 %v4926_v9 }
  0xc0   :  { %1373 = vmatprep.subr.bf16.mxu0 %v4931_v11  ;;  %1537 = vmatprep.subr.bf16.mxu1 %v4934_v12 }
  0xc2   :  { %1365 = vmatmul.mubr.bf16.vlgmr.msra.gmra.mrb[0].mxu0 %v45_v15  ;;  %1529 = vmatmul.mubr.bf16.vlgmr.msra.gmra.mrb[0].mxu1 %v45_v15 }
  0xc3   :  { %1374 = vmatpush1.bf16.msra.mxu0 %v4929_v13  ;;  %1538 = vmatpush1.bf16.msra.mxu1 %v4932_v14 }
  0xc4   :  { %1405 = vmatprep.mubr.bf16.mxu0 %v5359_v17  ;;  %1569 = vmatprep.mubr.bf16.mxu1 %v5359_v17 }
  0xc5   :  { %4505 = vmatprep.subr.bf16.mxu1 %v4935_v16 }
  0xce   :  { %4214 = vmatmul.mubr.msk.bf16.vlgmr.msra.gmra.mrb[0].mxu0 %vm1246_vm0, %v47_v20  ;;  %4215 = vmatmul.mubr.msk.bf16.vlgmr.msra.gmra.mrb[0].mxu1 %vm1246_vm0, %v47_v20 }
  0xcf   :  { %4506 = vmatpush3.bf16.msra.mxu1 %v4936_v19  ;;  %2172 = vmatprep.mubr.bf16.mxu0 %v5359_v17 }
  0xd0   :  { %4507 = vmatprep.subr.bf16.mxu1 %v4937_v21 }
  0xd3   :  { %4508 = vmatpush3.bf16.msra.mxu1 %v4938_v22 }
  0xd4   :  { %4509 = vmatprep.subr.bf16.mxu1 %v4939_v23 }
  0xd7   :  { %4510 = vmatpush3.bf16.msra.mxu1 %v4940_v24 }
  0xd8   :  { %4511 = vmatprep.subr.bf16.mxu1 %v4941_v25 }
  0xdb   :  { %4512 = vmatpush3.bf16.msra.mxu1 %v4942_v26 }
  0xdc   :  { %4513 = vmatprep.subr.bf16.mxu1 %v4943_v27 }
  0xdf   :  { %4514 = vmatpush3.bf16.msra.mxu1 %v4944_v28 }
  0xe0   :  { %4515 = vmatprep.subr.bf16.mxu1 %v4945_v29 }
  0xe3   :  { %4516 = vmatpush3.bf16.msra.mxu1 %v4946_v30 }
  0xe4   :  { %4517 = vmatprep.subr.bf16.mxu1 %v4947_v31 }
  0xe7   :  { %4518 = vmatpush3.bf16.msra.mxu1 %v4948_v32 }
  0xe8   :  { %14 = vsyncpa [#allocation3], 0  ;;  %v4949_v33 = vld [vmem:[%s6980_s3 + $0x78] sm:$0xff]   ;;  %v4951_v35 = vld [vmem:[%s6980_s3 + $0xc0] sm:$0xff]   ;;  %v246_v36 = vlaneseq }
  0xe9   :  { %v4950_v34 = vld [vmem:[%s6980_s3 + $0x38] sm:$0xff]   ;;  %4519 = vmatprep.subr.bf16.mxu1 %v4949_v33  ;;  %v244_v39 = vld [vmem:[%s6979_s2] sm:$0xf]  ;;  %v4953_v59 = vld [vmem:[%s6980_s3 + $0xc8] sm:$0xff]  }
  0xea   :  { %v6076_v37 = vshrl.u32 %v246_v36, 7  ;;  %v4952_v57 = vld [vmem:[%s6980_s3 + $0x80] sm:$0xff]   ;;  %v4954_v61 = vld [vmem:[%s6980_s3 + $0x88] sm:$0xff]   ;;  %v4955_v62 = vld [vmem:[%s6980_s3 + $0xd0] sm:$0xff]  }
  0xeb   :  { %4520 = vmatpush3.bf16.msra.mxu1 %v4950_v34  ;;  %v4956_v63 = vld [vmem:[%s6980_s3 + $0x90] sm:$0xff]   ;;  %v4957_v0 = vld [vmem:[%s6980_s3 + $0xd8] sm:$0xff]   ;;  %v4959_v2 = vld [vmem:[%s6980_s3 + $0xe0] sm:$0xff]  }
  0xec   :  { %4527 = vmatprep.subr.bf16.mxu1 %v4951_v35  ;;  %v6079_v38 = vsub.s32 0, %v6076_v37  ;;  %v6085_v40 = vsub.s32 1, %v6076_v37  ;;  %v6088_v41 = vsub.s32 3, %v6076_v37  ;;  %v4958_v1 = vld [vmem:[%s6980_s3 + $0x98] sm:$0xff]   ;;  %v4960_v3 = vld [vmem:[%s6980_s3 + $0xa0] sm:$0xff]   ;;  %v4961_v4 = vld [vmem:[%s6980_s3 + $0xe8] sm:$0xff]  }
  0xed   :  { %v4962_v5 = vld [vmem:[%s6980_s3 + $0xa8] sm:$0xff]   ;;  %v6127_v6 = vsub.s32 2, %v6076_v37  ;;  %v4963_v7 = vld [vmem:[%s6980_s3 + $0xf0] sm:$0xff]   ;;  %v4965_v10 = vld [vmem:[%s6980_s3 + $0xf8] sm:$0xff]  }
  0xee   :  { %v249_v42 = vrot.slane %v244_v39, %v6079_v38  ;;  %v253_v43 = vrot.slane %v244_v39, %v6085_v40  ;;  %v261_v44 = vrot.slane %v244_v39, %v6088_v41  ;;  %v4964_v8 = vld [vmem:[%s6980_s3 + $0xb0] sm:$0xff]   ;;  %v4966_v11 = vld [vmem:[%s6980_s3 + $0xb8] sm:$0xff]  }
  0xef   :  { %v257_v9 = vrot.slane %v244_v39, %v6127_v6  ;;  %v4967_v14 = vld [vmem:[%s6982_s5] ss:$16 sps:$4 sm:$0xff]   ;;  %v4969_v15 = vld [vmem:[%s6982_s5 + $0x4] ss:$16 sps:$4 sm:$0xff]   ;;  %v4970_v16 = vld [vmem:[%s6982_s5 + $0x8] ss:$16 sps:$4 sm:$0xff]  }
  0xf0   :  { %v4972_v18 = vld [vmem:[%s6982_s5 + $0xc] ss:$16 sps:$4 sm:$0xff]   ;;  %2140 = vmatprep.subr.bf16.mxu0 %v4969_v15  ;;  %v4973_v20 = vld [vmem:[%s6982_s5 + $0x20] ss:$16 sps:$4 sm:$0xff]   ;;  %v4976_v21 = vld [vmem:[%s6982_s5 + $0x28] ss:$16 sps:$4 sm:$0xff]  }
  0xf1   :  { %v4978_v19 = vld [vmem:[%s6982_s5 + $0x2c] ss:$16 sps:$4 sm:$0xff]   ;;  %2141 = vmatpush1.bf16.msra.mxu0 %v4967_v14  ;;  %v4981_v22 = vld [vmem:[%s6982_s5 + $0x44] ss:$16 sps:$4 sm:$0xff]   ;;  %v4979_v24 = vld [vmem:[%s6982_s5 + $0x40] ss:$16 sps:$4 sm:$0xff]  }
  0xf2   :  { %v4984_v23 = vld [vmem:[%s6982_s5 + $0x4c] ss:$16 sps:$4 sm:$0xff]   ;;  %v4982_v25 = vld [vmem:[%s6982_s5 + $0x48] ss:$16 sps:$4 sm:$0xff]   ;;  %v4987_v26 = vld [vmem:[%s6982_s5 + $0x64] ss:$16 sps:$4 sm:$0xff]  }
  0xf3   :  { %v4990_v27 = vld [vmem:[%s6982_s5 + $0x6c] ss:$16 sps:$4 sm:$0xff]   ;;  %v4985_v28 = vld [vmem:[%s6982_s5 + $0x60] ss:$16 sps:$4 sm:$0xff]   ;;  %v4988_v29 = vld [vmem:[%s6982_s5 + $0x68] ss:$16 sps:$4 sm:$0xff]  }
  0xf4   :  { %v4993_v30 = vld [vmem:[%s6982_s5 + $0x84] ss:$16 sps:$4 sm:$0xff]   ;;  %v4996_v31 = vld [vmem:[%s6982_s5 + $0x8c] ss:$16 sps:$4 sm:$0xff]   ;;  %v4991_v32 = vld [vmem:[%s6982_s5 + $0x80] ss:$16 sps:$4 sm:$0xff]  }
  0xf5   :  { %v4994_v33 = vld [vmem:[%s6982_s5 + $0x88] ss:$16 sps:$4 sm:$0xff]   ;;  %v4999_v34 = vld [vmem:[%s6982_s5 + $0xa4] ss:$16 sps:$4 sm:$0xff]   ;;  %v5002_v35 = vld [vmem:[%s6982_s5 + $0xac] ss:$16 sps:$4 sm:$0xff]  }
  0xf6   :  { %v4997_v36 = vld [vmem:[%s6982_s5 + $0xa0] ss:$16 sps:$4 sm:$0xff]   ;;  %v5000_v39 = vld [vmem:[%s6982_s5 + $0xa8] ss:$16 sps:$4 sm:$0xff]  }
  0xf7   :  { %v5038_v14 = vld [vmem:[%s6984_s7 + $0xb4] ss:$28 sps:$4 sm:$0xff]   ;;  %v5033_v15 = vld [vmem:[%s6984_s7 + $0xa8] ss:$28 sps:$4 sm:$0xff]  }
 0x1a1   :  { %v1407_v45 = vpop.f32.mrb[0].mxu0  ;;  %v1571_v46 = vpop.f32.mrb[0].mxu1 }
 0x1a2   :  { %v4593_v47 = vadd.f32 %v1407_v45, %v249_v42  ;;  %v1409_v48 = vpop.f32.mrb[1].mxu0  ;;  %v1573_v49 = vpop.f32.mrb[1].mxu1  ;;  %v4595_v12 = vadd.f32 %v1571_v46, %v257_v9  ;;  %v5005_v42 = vld [vmem:[%s6982_s5 + $0xc4] ss:$16 sps:$4 sm:$0xff]   ;;  %v5006_v45 = vld [vmem:[%s6982_s5 + $0xc8] ss:$16 sps:$4 sm:$0xff]  }
 0x1a3   :  { %v4594_v50 = vadd.f32 %v1409_v48, %v253_v43  ;;  %v4596_v51 = vadd.f32 %v1573_v49, %v261_v44  ;;  %v1411_v52 = vpop.f32.mrb[2].mxu0  ;;  %v1575_v53 = vpop.f32.mrb[2].mxu1  ;;  %v5008_v43 = vld [vmem:[%s6982_s5 + $0xcc] ss:$16 sps:$4 sm:$0xff]   ;;  %v5003_v44 = vld [vmem:[%s6982_s5 + $0xc0] ss:$16 sps:$4 sm:$0xff]  }
 0x1a4   :  { %v1412_v54 = vpop.f32.mrb[3].mxu0  ;;  %v1576_v55 = vpop.f32.mrb[3].mxu1  ;;  %v1578_v58 = vpack.c.bf16 %v4593_v47, %v4593_v47  ;;  %v1580_v13 = vpack.c.bf16 %v4595_v12, %v4595_v12  ;;  %v5011_v46 = vld [vmem:[%s6982_s5 + $0xe4] ss:$16 sps:$4 sm:$0xff]   ;;  %v5014_v47 = vld [vmem:[%s6982_s5 + $0xec] ss:$16 sps:$4 sm:$0xff]  }
 0x1a5   :  { %v1579_v56 = vpack.c.bf16 %v4594_v50, %v4594_v50  ;;  %v1581_v60 = vpack.c.bf16 %v4596_v51, %v4596_v51  ;;  %v5009_v48 = vld [vmem:[%s6982_s5 + $0xe0] ss:$16 sps:$4 sm:$0xff]   ;;  %v5012_v49 = vld [vmem:[%s6982_s5 + $0xe8] ss:$16 sps:$4 sm:$0xff]  }
 0x1a6   :  { %v5017_v50 = vld [vmem:[%s6984_s7 + $0x4] ss:$28 sps:$4 sm:$0xff]   ;;  %v5020_v51 = vld [vmem:[%s6984_s7 + $0xc] ss:$28 sps:$4 sm:$0xff]   ;;  %v5029_v9 = vld [vmem:[%s6984_s7 + $0x74] ss:$28 sps:$4 sm:$0xff]  }
 0x1a7   :  { %1877 = vmatprep.mubr.bf16.mxu1 %v1579_v56  ;;  %v5030_v12 = vld [vmem:[%s6984_s7 + $0x78] ss:$28 sps:$4 sm:$0xff]  }
 0x1a8   :  { %1878 = vmatmul.mubr.bf16.vlgmr.msra.gmra.mrb[4].mxu1 %v1578_v58 }
 0x1a9   :  { %4528 = vmatpush3.bf16.msra.mxu1 %v4952_v57  ;;  %1917 = vmatprep.mubr.bf16.mxu1 %v1581_v60  ;;  %v4216_v57 = vld [vmem:[%s6981_s4] ss:$0 sm:$0xff] }
 0x1aa   :  { %4529 = vmatprep.subr.bf16.mxu1 %v4953_v59 }
 0x1ad   :  { %4530 = vmatpush3.bf16.msra.mxu1 %v4954_v61 }
 0x1ae   :  { %4531 = vmatprep.subr.bf16.mxu1 %v4955_v62 }
 0x1b1   :  { %4532 = vmatpush3.bf16.msra.mxu1 %v4956_v63 }
 0x1b2   :  { %4533 = vmatprep.subr.bf16.mxu1 %v4957_v0 }
 0x1b5   :  { %4534 = vmatpush3.bf16.msra.mxu1 %v4958_v1  ;;  %v5015_v1 = vld [vmem:[%s6984_s7] ss:$28 sps:$4 sm:$0xff]  }
 0x1b6   :  { %4535 = vmatprep.subr.bf16.mxu1 %v4959_v2  ;;  %v5018_v2 = vld [vmem:[%s6984_s7 + $0x8] ss:$28 sps:$4 sm:$0xff]  }
 0x1b9   :  { %4536 = vmatpush3.bf16.msra.mxu1 %v4960_v3 }
 0x1ba   :  { %4537 = vmatprep.subr.bf16.mxu1 %v4961_v4  ;;  %v5023_v4 = vld [vmem:[%s6984_s7 + $0x3c] ss:$28 sps:$4 sm:$0xff]  }
 0x1bd   :  { %4538 = vmatpush3.bf16.msra.mxu1 %v4962_v5  ;;  %v5026_v5 = vld [vmem:[%s6984_s7 + $0x44] ss:$28 sps:$4 sm:$0xff]  }
 0x1be   :  { %4539 = vmatprep.subr.bf16.mxu1 %v4963_v7  ;;  %v5021_v7 = vld [vmem:[%s6984_s7 + $0x38] ss:$28 sps:$4 sm:$0xff]  }
 0x1c1   :  { %4540 = vmatpush3.bf16.msra.mxu1 %v4964_v8  ;;  %v5024_v8 = vld [vmem:[%s6984_s7 + $0x40] ss:$28 sps:$4 sm:$0xff]  }
 0x1c2   :  { %4541 = vmatprep.subr.bf16.mxu1 %v4965_v10  ;;  %v5032_v10 = vld [vmem:[%s6984_s7 + $0x7c] ss:$28 sps:$4 sm:$0xff]  }
 0x1c5   :  { %4542 = vmatpush3.bf16.msra.mxu1 %v4966_v11  ;;  %v5027_v11 = vld [vmem:[%s6984_s7 + $0x70] ss:$28 sps:$4 sm:$0xff]  }
 0x1c6   :  { %2181 = vmatprep.subr.bf16.mxu1 %v4972_v18  ;;  %v5041_v18 = vld [vmem:[%s6984_s7 + $0xe4] ss:$28 sps:$4 sm:$0xff]  }
 0x1c8   :  { %1918 = vmatmul.mubr.bf16.vlgmr.msra.gmra.mrb[8].mxu1 %v1580_v13  ;;  %v5035_v13 = vld [vmem:[%s6984_s7 + $0xac] ss:$28 sps:$4 sm:$0xff]  }
 0x1c9   :  { %2213 = vmatprep.mubr.bf16.mxu1 %v5359_v17  ;;  %v4975_v17 = vld [vmem:[%s6982_s5 + $0x24] ss:$16 sps:$4 sm:$0xff]   ;;  %2182 = vmatpush1.bf16.msra.mxu1 %v4970_v16  ;;  %v5036_v16 = vld [vmem:[%s6984_s7 + $0xb0] ss:$28 sps:$4 sm:$0xff]  }
 0x1ca   :  { %2142 = vmatprep.subr.bf16.mxu0 %v4975_v17  ;;  %2183 = vmatprep.subr.bf16.mxu1 %v4978_v19  ;;  %v5044_v17 = vld [vmem:[%s6984_s7 + $0xec] ss:$28 sps:$4 sm:$0xff]   ;;  %v5039_v19 = vld [vmem:[%s6984_s7 + $0xe0] ss:$28 sps:$4 sm:$0xff]  }
 0x1cb   :  { %2143 = vmatpush1.bf16.msra.mxu0 %v4973_v20  ;;  %v5042_v20 = vld [vmem:[%s6984_s7 + $0xe8] ss:$28 sps:$4 sm:$0xff]  }
 0x1cc   :  { %2144 = vmatprep.subr.bf16.mxu0 %v4981_v22  ;;  %v5050_v22 = vld [vmem:[%s6984_s7 + $0x124] ss:$28 sps:$4 sm:$0xff]  }
 0x1cd   :  { %2184 = vmatpush1.bf16.msra.mxu1 %v4976_v21  ;;  %v5047_v21 = vld [vmem:[%s6984_s7 + $0x11c] ss:$28 sps:$4 sm:$0xff]  }
 0x1ce   :  { %2185 = vmatprep.subr.bf16.mxu1 %v4984_v23  ;;  %v5045_v23 = vld [vmem:[%s6984_s7 + $0x118] ss:$28 sps:$4 sm:$0xff]  }
 0x1cf   :  { %2145 = vmatpush1.bf16.msra.mxu0 %v4979_v24  ;;  %v5048_v24 = vld [vmem:[%s6984_s7 + $0x120] ss:$28 sps:$4 sm:$0xff]  }
 0x1d0   :  { %2146 = vmatprep.subr.bf16.mxu0 %v4987_v26  ;;  %v5056_v26 = vld [vmem:[%s6984_s7 + $0x15c] ss:$28 sps:$4 sm:$0xff]  }
 0x1d1   :  { %2186 = vmatpush1.bf16.msra.mxu1 %v4982_v25  ;;  %v5053_v25 = vld [vmem:[%s6984_s7 + $0x154] ss:$28 sps:$4 sm:$0xff]  }
 0x1d2   :  { %2187 = vmatprep.subr.bf16.mxu1 %v4990_v27  ;;  %v5051_v27 = vld [vmem:[%s6984_s7 + $0x150] ss:$28 sps:$4 sm:$0xff]  }
 0x1d3   :  { %2147 = vmatpush1.bf16.msra.mxu0 %v4985_v28  ;;  %v5054_v28 = vld [vmem:[%s6984_s7 + $0x158] ss:$28 sps:$4 sm:$0xff]  }
 0x1d4   :  { %2148 = vmatprep.subr.bf16.mxu0 %v4993_v30  ;;  %v5062_v30 = vld [vmem:[%s6984_s7 + $0x194] ss:$28 sps:$4 sm:$0xff]  }
 0x1d5   :  { %2188 = vmatpush1.bf16.msra.mxu1 %v4988_v29  ;;  %v5059_v29 = vld [vmem:[%s6984_s7 + $0x18c] ss:$28 sps:$4 sm:$0xff]  }
 0x1d6   :  { %2189 = vmatprep.subr.bf16.mxu1 %v4996_v31  ;;  %v5057_v31 = vld [vmem:[%s6984_s7 + $0x188] ss:$28 sps:$4 sm:$0xff]  }
 0x1d7   :  { %2149 = vmatpush1.bf16.msra.mxu0 %v4991_v32  ;;  %v5060_v32 = vld [vmem:[%s6984_s7 + $0x190] ss:$28 sps:$4 sm:$0xff]  }
 0x1d8   :  { %2150 = vmatprep.subr.bf16.mxu0 %v4999_v34  ;;  %v5068_v34 = vld [vmem:[%s6984_s7 + $0x1cc] ss:$28 sps:$4 sm:$0xff]  }
 0x1d9   :  { %2190 = vmatpush1.bf16.msra.mxu1 %v4994_v33  ;;  %v5065_v33 = vld [vmem:[%s6984_s7 + $0x1c4] ss:$28 sps:$4 sm:$0xff]  }
 0x1da   :  { %2191 = vmatprep.subr.bf16.mxu1 %v5002_v35  ;;  %v5063_v35 = vld [vmem:[%s6984_s7 + $0x1c0] ss:$28 sps:$4 sm:$0xff]  }
 0x1db   :  { %2151 = vmatpush1.bf16.msra.mxu0 %v4997_v36  ;;  %v5066_v36 = vld [vmem:[%s6984_s7 + $0x1c8] ss:$28 sps:$4 sm:$0xff]  }
 0x1dc   :  { %2152 = vmatprep.subr.bf16.mxu0 %v5005_v42  ;;  %v5074_v42 = vld [vmem:[%s6984_s7 + $0x204] ss:$28 sps:$4 sm:$0xff]  }
 0x1dd   :  { %2192 = vmatpush1.bf16.msra.mxu1 %v5000_v39  ;;  %v5071_v39 = vld [vmem:[%s6984_s7 + $0x1fc] ss:$28 sps:$4 sm:$0xff]  }
 0x1de   :  { %2193 = vmatprep.subr.bf16.mxu1 %v5008_v43  ;;  %v5069_v43 = vld [vmem:[%s6984_s7 + $0x1f8] ss:$28 sps:$4 sm:$0xff]  }
 0x1df   :  { %2153 = vmatpush1.bf16.msra.mxu0 %v5003_v44  ;;  %v5072_v44 = vld [vmem:[%s6984_s7 + $0x200] ss:$28 sps:$4 sm:$0xff]  }
 0x1e0   :  { %2154 = vmatprep.subr.bf16.mxu0 %v5011_v46  ;;  %v5080_v46 = vld [vmem:[%s6984_s7 + $0x23c] ss:$28 sps:$4 sm:$0xff]  }
 0x1e1   :  { %2194 = vmatpush1.bf16.msra.mxu1 %v5006_v45  ;;  %v5077_v45 = vld [vmem:[%s6984_s7 + $0x234] ss:$28 sps:$4 sm:$0xff]  }
 0x1e2   :  { %2195 = vmatprep.subr.bf16.mxu1 %v5014_v47  ;;  %v5075_v47 = vld [vmem:[%s6984_s7 + $0x230] ss:$28 sps:$4 sm:$0xff]  }
 0x1e3   :  { %2155 = vmatpush1.bf16.msra.mxu0 %v5009_v48  ;;  %v5078_v48 = vld [vmem:[%s6984_s7 + $0x238] ss:$28 sps:$4 sm:$0xff]  }
 0x1e4   :  { %3671 = vmatprep.subr.bf16.mxu0 %v5017_v50  ;;  %v5086_v50 = vld [vmem:[%s6984_s7 + $0x274] ss:$28 sps:$4 sm:$0xff]  }
 0x1e5   :  { %2196 = vmatpush1.bf16.msra.mxu1 %v5012_v49  ;;  %v5083_v49 = vld [vmem:[%s6984_s7 + $0x26c] ss:$28 sps:$4 sm:$0xff]  }
 0x1e6   :  { %3753 = vmatprep.subr.bf16.mxu1 %v5020_v51  ;;  %v5081_v51 = vld [vmem:[%s6984_s7 + $0x268] ss:$28 sps:$4 sm:$0xff]  }
 0x27b   :  { %v4521_v52 = vpop.f32.mrb[4].mxu1 }
 0x27c   :  { %v4522_v53 = vpop.f32.mrb[5].mxu1 }
 0x27d   :  { %v4523_v54 = vadd.f32 %v4522_v53, %v4521_v52  ;;  %v4524_v55 = vpop.f32.mrb[6].mxu1  ;;  %v5084_v52 = vld [vmem:[%s6984_s7 + $0x270] ss:$28 sps:$4 sm:$0xff]   ;;  %v5089_v53 = vld [vmem:[%s6984_s7 + $0x2a4] ss:$28 sps:$4 sm:$0xff]  }
 0x27e   :  { %v4525_v56 = vpop.f32.mrb[7].mxu1  ;;  %v5087_v55 = vld [vmem:[%s6984_s7 + $0x2a0] ss:$28 sps:$4 sm:$0xff]  }
 0x27f   :  { %v1880_v60 = vadd.f32 %v4523_v54, %v4216_v57  ;;  %v5092_v54 = vld [vmem:[%s6984_s7 + $0x2ac] ss:$28 sps:$4 sm:$0xff]   ;;  %v5095_v57 = vld [vmem:[%s6984_s7 + $0x2dc] ss:$28 sps:$4 sm:$0xff]  }
 0x280   :  { %v5090_v56 = vld [vmem:[%s6984_s7 + $0x2a8] ss:$28 sps:$4 sm:$0xff]  }
 0x29b   :  { %v4543_v58 = vpop.f32.mrb[8].mxu1 }
 0x29c   :  { %v4544_v59 = vpop.f32.mrb[9].mxu1 }
 0x29d   :  { %v4545_v61 = vadd.f32 %v4544_v59, %v4543_v58  ;;  %v4546_v62 = vpop.f32.mrb[10].mxu1  ;;  %v5098_v58 = vld [vmem:[%s6984_s7 + $0x2e4] ss:$28 sps:$4 sm:$0xff]   ;;  %v5093_v59 = vld [vmem:[%s6984_s7 + $0x2d8] ss:$28 sps:$4 sm:$0xff]  }
 0x29e   :  { %v4547_v63 = vpop.f32.mrb[11].mxu1  ;;  %v5104_v62 = vld [vmem:[%s6984_s7 + $0x31c] ss:$28 sps:$4 sm:$0xff]  }
 0x29f   :  { %v1920_v0 = vadd.f32 %v4545_v61, %v1880_v60  ;;  %v5096_v60 = vld [vmem:[%s6984_s7 + $0x2e0] ss:$28 sps:$4 sm:$0xff]   ;;  %v5101_v61 = vld [vmem:[%s6984_s7 + $0x314] ss:$28 sps:$4 sm:$0xff]  }
 0x2a0   :  { %v5099_v63 = vld [vmem:[%s6984_s7 + $0x310] ss:$28 sps:$4 sm:$0xff]  }
 0x2a1   :  { %v1925_v3 = vpack.c.bf16 %v1920_v0, %v1920_v0  ;;  %v5102_v0 = vld [vmem:[%s6984_s7 + $0x318] ss:$28 sps:$4 sm:$0xff]  }
 0x2a3   :  { %2173 = vmatmul.mubr.bf16.vlgmr.msra.gmra.mrb[4].mxu0 %v1925_v3  ;;  %2214 = vmatmul.mubr.bf16.vlgmr.msra.gmra.mrb[12].mxu1 %v1925_v3  ;;  %v5105_v3 = vld [vmem:[%s6984_s7 + $0x348] ss:$28 sps:$4 sm:$0xff]  }
 0x2a4   :  { %3672 = vmatpush1.bf16.msra.mxu0 %v5015_v1  ;;  %3754 = vmatpush1.bf16.msra.mxu1 %v5018_v2  ;;  %v5107_v1 = vld [vmem:[%s6984_s7 + $0x34c] ss:$28 sps:$4 sm:$0xff]   ;;  %v5110_v2 = vld [vmem:[%s6984_s7 + $0x354] ss:$28 sps:$4 sm:$0xff]  }
 0x2a5   :  { %3673 = vmatprep.subr.bf16.mxu0 %v5023_v4  ;;  %3755 = vmatprep.subr.bf16.mxu1 %v5026_v5  ;;  %v5108_v4 = vld [vmem:[%s6984_s7 + $0x350] ss:$28 sps:$4 sm:$0xff]   ;;  %v5113_v5 = vld [vmem:[%s6984_s7 + $0x384] ss:$28 sps:$4 sm:$0xff]  }
 0x2a8   :  { %3674 = vmatpush1.bf16.msra.mxu0 %v5021_v7  ;;  %3756 = vmatpush1.bf16.msra.mxu1 %v5024_v8  ;;  %v5116_v7 = vld [vmem:[%s6984_s7 + $0x38c] ss:$28 sps:$4 sm:$0xff]   ;;  %v6443_v8 = vld [vmem:[%s6983_s6] sm:$0xf] }
 0x2a9   :  { %3675 = vmatprep.subr.bf16.mxu0 %v5029_v9  ;;  %3757 = vmatprep.subr.bf16.mxu1 %v5032_v10  ;;  %v1963_v9 = vrot.slane %v6443_v8, %v6079_v38  ;;  %v1967_v10 = vrot.slane %v6443_v8, %v6085_v40 }
 0x2ac   :  { %3676 = vmatpush1.bf16.msra.mxu0 %v5027_v11  ;;  %3758 = vmatpush1.bf16.msra.mxu1 %v5030_v12  ;;  %v1975_v11 = vrot.slane %v6443_v8, %v6088_v41 }
 0x2ad   :  { %3677 = vmatprep.subr.bf16.mxu0 %v5035_v13  ;;  %3759 = vmatprep.subr.bf16.mxu1 %v5038_v14 }
 0x2b0   :  { %3678 = vmatpush1.bf16.msra.mxu0 %v5033_v15  ;;  %3760 = vmatpush1.bf16.msra.mxu1 %v5036_v16 }
 0x2b1   :  { %3679 = vmatprep.subr.bf16.mxu0 %v5041_v18  ;;  %3761 = vmatprep.subr.bf16.mxu1 %v5044_v17 }
 0x2b4   :  { %3680 = vmatpush1.bf16.msra.mxu0 %v5039_v19  ;;  %3762 = vmatpush1.bf16.msra.mxu1 %v5042_v20 }
 0x2b5   :  { %3681 = vmatprep.subr.bf16.mxu0 %v5047_v21  ;;  %3763 = vmatprep.subr.bf16.mxu1 %v5050_v22 }
 0x2b8   :  { %3682 = vmatpush1.bf16.msra.mxu0 %v5045_v23  ;;  %3764 = vmatpush1.bf16.msra.mxu1 %v5048_v24  ;;  %v5111_v24 = vld [vmem:[%s6984_s7 + $0x380] ss:$28 sps:$4 sm:$0xff]  }
 0x2b9   :  { %3683 = vmatprep.subr.bf16.mxu0 %v5053_v25  ;;  %3765 = vmatprep.subr.bf16.mxu1 %v5056_v26  ;;  %v5114_v25 = vld [vmem:[%s6984_s7 + $0x388] ss:$28 sps:$4 sm:$0xff]  }
 0x2bc   :  { %3684 = vmatpush1.bf16.msra.mxu0 %v5051_v27  ;;  %3766 = vmatpush1.bf16.msra.mxu1 %v5054_v28  ;;  %v5119_v27 = vld [vmem:[%s6984_s7 + $0x3bc] ss:$28 sps:$4 sm:$0xff]   ;;  %v5122_v28 = vld [vmem:[%s6984_s7 + $0x3c4] ss:$28 sps:$4 sm:$0xff]  }
 0x2bd   :  { %3685 = vmatprep.subr.bf16.mxu0 %v5059_v29  ;;  %3767 = vmatprep.subr.bf16.mxu1 %v5062_v30  ;;  %v5117_v30 = vld [vmem:[%s6984_s7 + $0x3b8] ss:$28 sps:$4 sm:$0xff]  }
 0x2c0   :  { %3686 = vmatpush1.bf16.msra.mxu0 %v5057_v31  ;;  %3768 = vmatpush1.bf16.msra.mxu1 %v5060_v32  ;;  %v5120_v31 = vld [vmem:[%s6984_s7 + $0x3c0] ss:$28 sps:$4 sm:$0xff]   ;;  %v5125_v32 = vld [vmem:[%s6984_s7 + $0x3f4] ss:$28 sps:$4 sm:$0xff]  }
 0x2c1   :  { %3687 = vmatprep.subr.bf16.mxu0 %v5065_v33  ;;  %3769 = vmatprep.subr.bf16.mxu1 %v5068_v34  ;;  %v5128_v33 = vld [vmem:[%s6984_s7 + $0x3fc] ss:$28 sps:$4 sm:$0xff]   ;;  %v5123_v34 = vld [vmem:[%s6984_s7 + $0x3f0] ss:$28 sps:$4 sm:$0xff]  }
 0x2c4   :  { %3688 = vmatpush1.bf16.msra.mxu0 %v5063_v35  ;;  %3770 = vmatpush1.bf16.msra.mxu1 %v5066_v36  ;;  %v5126_v35 = vld [vmem:[%s6984_s7 + $0x3f8] ss:$28 sps:$4 sm:$0xff]   ;;  %v5131_v36 = vld [vmem:[%s6984_s7 + $0x42c] ss:$28 sps:$4 sm:$0xff]  }
 0x2c5   :  { %3689 = vmatprep.subr.bf16.mxu0 %v5071_v39  ;;  %3771 = vmatprep.subr.bf16.mxu1 %v5074_v42  ;;  %v5134_v39 = vld [vmem:[%s6984_s7 + $0x434] ss:$28 sps:$4 sm:$0xff]   ;;  %v5129_v42 = vld [vmem:[%s6984_s7 + $0x428] ss:$28 sps:$4 sm:$0xff]  }
 0x2c8   :  { %3690 = vmatpush1.bf16.msra.mxu0 %v5069_v43  ;;  %3772 = vmatpush1.bf16.msra.mxu1 %v5072_v44  ;;  %v5132_v43 = vld [vmem:[%s6984_s7 + $0x430] ss:$28 sps:$4 sm:$0xff]   ;;  %v5137_v44 = vld [vmem:[%s6984_s7 + $0x464] ss:$28 sps:$4 sm:$0xff]  }
 0x2c9   :  { %3691 = vmatprep.subr.bf16.mxu0 %v5077_v45  ;;  %3773 = vmatprep.subr.bf16.mxu1 %v5080_v46  ;;  %v5140_v45 = vld [vmem:[%s6984_s7 + $0x46c] ss:$28 sps:$4 sm:$0xff]   ;;  %v5135_v46 = vld [vmem:[%s6984_s7 + $0x460] ss:$28 sps:$4 sm:$0xff]  }
 0x2cc   :  { %3692 = vmatpush1.bf16.msra.mxu0 %v5075_v47  ;;  %3774 = vmatpush1.bf16.msra.mxu1 %v5078_v48  ;;  %v5138_v47 = vld [vmem:[%s6984_s7 + $0x468] ss:$28 sps:$4 sm:$0xff]   ;;  %v5143_v48 = vld [vmem:[%s6984_s7 + $0x49c] ss:$28 sps:$4 sm:$0xff]  }
 0x2cd   :  { %3693 = vmatprep.subr.bf16.mxu0 %v5083_v49  ;;  %3775 = vmatprep.subr.bf16.mxu1 %v5086_v50  ;;  %v5146_v49 = vld [vmem:[%s6984_s7 + $0x4a4] ss:$28 sps:$4 sm:$0xff]   ;;  %v5141_v50 = vld [vmem:[%s6984_s7 + $0x498] ss:$28 sps:$4 sm:$0xff]  }
 0x2d0   :  { %3694 = vmatpush1.bf16.msra.mxu0 %v5081_v51  ;;  %3776 = vmatpush1.bf16.msra.mxu1 %v5084_v52  ;;  %v5144_v51 = vld [vmem:[%s6984_s7 + $0x4a0] ss:$28 sps:$4 sm:$0xff]   ;;  %v5149_v52 = vld [vmem:[%s6984_s7 + $0x4d4] ss:$28 sps:$4 sm:$0xff]  }
 0x2d1   :  { %3695 = vmatprep.subr.bf16.mxu0 %v5089_v53  ;;  %3777 = vmatprep.subr.bf16.mxu1 %v5092_v54  ;;  %v5152_v53 = vld [vmem:[%s6984_s7 + $0x4dc] ss:$28 sps:$4 sm:$0xff]   ;;  %v5147_v54 = vld [vmem:[%s6984_s7 + $0x4d0] ss:$28 sps:$4 sm:$0xff]  }
 0x2d4   :  { %3696 = vmatpush1.bf16.msra.mxu0 %v5087_v55  ;;  %3778 = vmatpush1.bf16.msra.mxu1 %v5090_v56  ;;  %v5150_v55 = vld [vmem:[%s6984_s7 + $0x4d8] ss:$28 sps:$4 sm:$0xff]   ;;  %v5155_v56 = vld [vmem:[%s6984_s7 + $0x50c] ss:$28 sps:$4 sm:$0xff]  }
 0x2d5   :  { %3697 = vmatprep.subr.bf16.mxu0 %v5095_v57  ;;  %3779 = vmatprep.subr.bf16.mxu1 %v5098_v58  ;;  %v5158_v57 = vld [vmem:[%s6984_s7 + $0x514] ss:$28 sps:$4 sm:$0xff]   ;;  %v5153_v58 = vld [vmem:[%s6984_s7 + $0x508] ss:$28 sps:$4 sm:$0xff]  }
 0x2d8   :  { %3698 = vmatpush1.bf16.msra.mxu0 %v5093_v59  ;;  %3780 = vmatpush1.bf16.msra.mxu1 %v5096_v60  ;;  %v5156_v59 = vld [vmem:[%s6984_s7 + $0x510] ss:$28 sps:$4 sm:$0xff]   ;;  %v5161_v60 = vld [vmem:[%s6984_s7 + $0x544] ss:$28 sps:$4 sm:$0xff]  }
 0x2d9   :  { %3699 = vmatprep.subr.bf16.mxu0 %v5101_v61  ;;  %3781 = vmatprep.subr.bf16.mxu1 %v5104_v62  ;;  %v5164_v61 = vld [vmem:[%s6984_s7 + $0x54c] ss:$28 sps:$4 sm:$0xff]   ;;  %v5159_v62 = vld [vmem:[%s6984_s7 + $0x540] ss:$28 sps:$4 sm:$0xff]  }
 0x2dc   :  { %3700 = vmatpush1.bf16.msra.mxu0 %v5099_v63  ;;  %3782 = vmatpush1.bf16.msra.mxu1 %v5102_v0  ;;  %v5162_v63 = vld [vmem:[%s6984_s7 + $0x548] ss:$28 sps:$4 sm:$0xff]   ;;  %v5167_v0 = vld [vmem:[%s6984_s7 + $0x57c] ss:$28 sps:$4 sm:$0xff]  }
 0x2dd   :  { %3701 = vmatprep.subr.bf16.mxu0 %v5107_v1  ;;  %3783 = vmatprep.subr.bf16.mxu1 %v5110_v2  ;;  %v5170_v1 = vld [vmem:[%s6984_s7 + $0x584] ss:$28 sps:$4 sm:$0xff]   ;;  %v5165_v2 = vld [vmem:[%s6984_s7 + $0x578] ss:$28 sps:$4 sm:$0xff]  }
 0x2e0   :  { %3702 = vmatpush1.bf16.msra.mxu0 %v5105_v3  ;;  %3784 = vmatpush1.bf16.msra.mxu1 %v5108_v4  ;;  %v5168_v3 = vld [vmem:[%s6984_s7 + $0x580] ss:$28 sps:$4 sm:$0xff]   ;;  %v5173_v4 = vld [vmem:[%s6984_s7 + $0x5b4] ss:$28 sps:$4 sm:$0xff]  }
 0x2e1   :  { %3712 = vmatprep.subr.bf16.mxu0 %v5113_v5  ;;  %3794 = vmatprep.subr.bf16.mxu1 %v5116_v7  ;;  %v5176_v5 = vld [vmem:[%s6984_s7 + $0x5bc] ss:$28 sps:$4 sm:$0xff]   ;;  %v5171_v7 = vld [vmem:[%s6984_s7 + $0x5b0] ss:$28 sps:$4 sm:$0xff]  }
 0x376   :  { %v2174_v12 = vpop.f32.mrb[4].mxu0  ;;  %v6451_v13 = vpop.f32.mrb[12].mxu1 }
 0x377   :  { %v2175_v14 = vadd.f32 %v2174_v12, %v1963_v9  ;;  %v2176_v15 = vpop.f32.mrb[5].mxu0  ;;  %v2217_v16 = vpop.f32.mrb[13].mxu1  ;;  %v5174_v9 = vld [vmem:[%s6984_s7 + $0x5b8] ss:$28 sps:$4 sm:$0xff]   ;;  %v5177_v12 = vld [vmem:[%s6984_s7 + $0x5e8] ss:$28 sps:$4 sm:$0xff]  }
 0x378   :  { %v2177_v18 = vadd.f32 %v2176_v15, %v1967_v10  ;;  %v2178_v17 = vpop.f32.mrb[6].mxu0  ;;  %v2219_v19 = vpop.f32.mrb[14].mxu1  ;;  %v2218_v20 = vadd.f32 %v2217_v16, %v1975_v11  ;;  %v5179_v10 = vld [vmem:[%s6984_s7 + $0x5ec] ss:$28 sps:$4 sm:$0xff]   ;;  %v5182_v11 = vld [vmem:[%s6984_s7 + $0x5f4] ss:$28 sps:$4 sm:$0xff]  }
 0x379   :  { %v2179_v21 = vpop.f32.mrb[7].mxu0  ;;  %v2220_v22 = vpop.f32.mrb[15].mxu1  ;;  %v6461_v26 = vpack.c.bf16 %v2175_v14, %v2175_v14  ;;  %v5180_v14 = vld [vmem:[%s6984_s7 + $0x5f0] ss:$28 sps:$4 sm:$0xff]   ;;  %v5185_v15 = vld [vmem:[%s6984_s7 + $0x624] ss:$28 sps:$4 sm:$0xff]  }
 0x37a   :  { %v6453_v23 = vpack.c.bf16 %v2177_v18, %v2177_v18  ;;  %v6471_v29 = vpack.c.bf16 %v2218_v20, %v2218_v20  ;;  %v5188_v16 = vld [vmem:[%s6984_s7 + $0x62c] ss:$28 sps:$4 sm:$0xff]   ;;  %v5183_v18 = vld [vmem:[%s6984_s7 + $0x620] ss:$28 sps:$4 sm:$0xff]   ;;  %v5189_v21 = vld [vmem:[%s6984_s7 + $0x658] ss:$28 sps:$4 sm:$0xff]  }
 0x37b   :  { %v5186_v17 = vld [vmem:[%s6984_s7 + $0x628] ss:$28 sps:$4 sm:$0xff]   ;;  %v5191_v19 = vld [vmem:[%s6984_s7 + $0x65c] ss:$28 sps:$4 sm:$0xff]  }
 0x37c   :  { %3703 = vmatprep.mubr.bf16.mxu0 %v6453_v23  ;;  %3785 = vmatprep.mubr.bf16.mxu1 %v6453_v23  ;;  %v5194_v20 = vld [vmem:[%s6984_s7 + $0x664] ss:$28 sps:$4 sm:$0xff]  }
 0x37d   :  { %3704 = vmatmul.mubr.bf16.vlgmr.msra.gmra.mrb[8].mxu0 %v6461_v26  ;;  %3786 = vmatmul.mubr.bf16.vlgmr.msra.gmra.mrb[16].mxu1 %v6461_v26  ;;  %v5192_v22 = vld [vmem:[%s6984_s7 + $0x660] ss:$28 sps:$4 sm:$0xff]  }
 0x37e   :  { %3713 = vmatpush1.bf16.msra.mxu0 %v5111_v24  ;;  %3795 = vmatpush1.bf16.msra.mxu1 %v5114_v25  ;;  %v5197_v24 = vld [vmem:[%s6984_s7 + $0x694] ss:$28 sps:$4 sm:$0xff]   ;;  %v5200_v25 = vld [vmem:[%s6984_s7 + $0x69c] ss:$28 sps:$4 sm:$0xff]  }
 0x37f   :  { %3744 = vmatprep.mubr.bf16.mxu0 %v6471_v29  ;;  %3826 = vmatprep.mubr.bf16.mxu1 %v6471_v29 }
 0x380   :  { %3714 = vmatprep.subr.bf16.mxu0 %v5119_v27  ;;  %3796 = vmatprep.subr.bf16.mxu1 %v5122_v28  ;;  %v5195_v27 = vld [vmem:[%s6984_s7 + $0x690] ss:$28 sps:$4 sm:$0xff]   ;;  %v5198_v28 = vld [vmem:[%s6984_s7 + $0x698] ss:$28 sps:$4 sm:$0xff]  }
 0x382   :  { %3715 = vmatpush1.bf16.msra.mxu0 %v5117_v30  ;;  %3797 = vmatpush1.bf16.msra.mxu1 %v5120_v31  ;;  %v1971_v30 = vrot.slane %v6443_v8, %v6127_v6  ;;  %v5203_v31 = vld [vmem:[%s6984_s7 + $0x6cc] ss:$28 sps:$4 sm:$0xff]  }
 0x383   :  { %3716 = vmatprep.subr.bf16.mxu0 %v5125_v32  ;;  %3798 = vmatprep.subr.bf16.mxu1 %v5128_v33  ;;  %v5206_v32 = vld [vmem:[%s6984_s7 + $0x6d4] ss:$28 sps:$4 sm:$0xff]   ;;  %v5201_v33 = vld [vmem:[%s6984_s7 + $0x6c8] ss:$28 sps:$4 sm:$0xff]  }
 0x384   :  { %v5204_v8 = vld [vmem:[%s6984_s7 + $0x6d0] ss:$28 sps:$4 sm:$0xff]  }
 0x386   :  { %3717 = vmatpush1.bf16.msra.mxu0 %v5123_v34  ;;  %3799 = vmatpush1.bf16.msra.mxu1 %v5126_v35  ;;  %v2216_v34 = vadd.f32 %v6451_v13, %v1971_v30  ;;  %v5209_v35 = vld [vmem:[%s6984_s7 + $0x14] ss:$28 sps:$4 sm:$0xff]  }
 0x387   :  { %3718 = vmatprep.subr.bf16.mxu0 %v5131_v36  ;;  %3800 = vmatprep.subr.bf16.mxu1 %v5134_v39  ;;  %v5210_v36 = vld [vmem:[%s6984_s7 + $0x1d8] ss:$28 sps:$4 sm:$0xff]   ;;  %v5207_v39 = vld [vmem:[%s6984_s7 + $0x10] ss:$28 sps:$4 sm:$0xff]  }
 0x388   :  { %v5211_v13 = vld [vmem:[%s6984_s7 + $0x18] ss:$28 sps:$4 sm:$0xff]   ;;  %v5267_v30 = vld [vmem:[%s6984_s7 + $0x2b0] ss:$28 sps:$4 sm:$0xff]  }
 0x38a   :  { %3719 = vmatpush1.bf16.msra.mxu0 %v5129_v42  ;;  %3801 = vmatpush1.bf16.msra.mxu1 %v5132_v43  ;;  %v6663_v42 = vpack.c.bf16 %v2216_v34, %v2216_v34  ;;  %v5214_v43 = vld [vmem:[%s6984_s7 + $0x4c] ss:$28 sps:$4 sm:$0xff]  }
 0x38b   :  { %3720 = vmatprep.subr.bf16.mxu0 %v5137_v44  ;;  %3802 = vmatprep.subr.bf16.mxu1 %v5140_v45  ;;  %v5215_v44 = vld [vmem:[%s6984_s7 + $0x210] ss:$28 sps:$4 sm:$0xff]   ;;  %v5212_v45 = vld [vmem:[%s6984_s7 + $0x48] ss:$28 sps:$4 sm:$0xff]  }
 0x38c   :  { %v5276_v34 = vld [vmem:[%s6984_s7 + $0x4b0] ss:$28 sps:$4 sm:$0xff]  }
 0x38e   :  { %3721 = vmatpush1.bf16.msra.mxu0 %v5135_v46  ;;  %3803 = vmatpush1.bf16.msra.mxu1 %v5138_v47  ;;  %v5216_v46 = vld [vmem:[%s6984_s7 + $0x50] ss:$28 sps:$4 sm:$0xff]   ;;  %v5219_v47 = vld [vmem:[%s6984_s7 + $0x84] ss:$28 sps:$4 sm:$0xff]  }
 0x38f   :  { %3722 = vmatprep.subr.bf16.mxu0 %v5143_v48  ;;  %3804 = vmatprep.subr.bf16.mxu1 %v5146_v49  ;;  %v5220_v48 = vld [vmem:[%s6984_s7 + $0x248] ss:$28 sps:$4 sm:$0xff]   ;;  %v5217_v49 = vld [vmem:[%s6984_s7 + $0x80] ss:$28 sps:$4 sm:$0xff]  }
 0x392   :  { %3723 = vmatpush1.bf16.msra.mxu0 %v5141_v50  ;;  %3805 = vmatpush1.bf16.msra.mxu1 %v5144_v51  ;;  %v5224_v50 = vld [vmem:[%s6984_s7 + $0xbc] ss:$28 sps:$4 sm:$0xff]  }
 0x393   :  { %3724 = vmatprep.subr.bf16.mxu0 %v5149_v52  ;;  %3806 = vmatprep.subr.bf16.mxu1 %v5152_v53  ;;  %v5225_v51 = vld [vmem:[%s6984_s7 + $0x280] ss:$28 sps:$4 sm:$0xff]   ;;  %v5222_v52 = vld [vmem:[%s6984_s7 + $0xb8] ss:$28 sps:$4 sm:$0xff]  }
 0x394   :  { %v5226_v53 = vld [vmem:[%s6984_s7 + $0xc0] ss:$28 sps:$4 sm:$0xff]  }
 0x396   :  { %3725 = vmatpush1.bf16.msra.mxu0 %v5147_v54  ;;  %3807 = vmatpush1.bf16.msra.mxu1 %v5150_v55  ;;  %v5229_v54 = vld [vmem:[%s6984_s7 + $0xf4] ss:$28 sps:$4 sm:$0xff]  }
 0x397   :  { %3726 = vmatprep.subr.bf16.mxu0 %v5155_v56  ;;  %3808 = vmatprep.subr.bf16.mxu1 %v5158_v57  ;;  %v5230_v55 = vld [vmem:[%s6984_s7 + $0x2b8] ss:$28 sps:$4 sm:$0xff]   ;;  %v5227_v56 = vld [vmem:[%s6984_s7 + $0xf0] ss:$28 sps:$4 sm:$0xff]  }
 0x398   :  { %v5231_v57 = vld [vmem:[%s6984_s7 + $0xf8] ss:$28 sps:$4 sm:$0xff]  }
 0x39a   :  { %3727 = vmatpush1.bf16.msra.mxu0 %v5153_v58  ;;  %3809 = vmatpush1.bf16.msra.mxu1 %v5156_v59  ;;  %v5234_v58 = vld [vmem:[%s6984_s7 + $0x12c] ss:$28 sps:$4 sm:$0xff]  }
 0x39b   :  { %3728 = vmatprep.subr.bf16.mxu0 %v5161_v60  ;;  %3810 = vmatprep.subr.bf16.mxu1 %v5164_v61  ;;  %v5235_v59 = vld [vmem:[%s6984_s7 + $0x2f0] ss:$28 sps:$4 sm:$0xff]   ;;  %v5232_v60 = vld [vmem:[%s6984_s7 + $0x128] ss:$28 sps:$4 sm:$0xff]  }
 0x39c   :  { %v5236_v61 = vld [vmem:[%s6984_s7 + $0x130] ss:$28 sps:$4 sm:$0xff]  }
 0x39e   :  { %3729 = vmatpush1.bf16.msra.mxu0 %v5159_v62  ;;  %3811 = vmatpush1.bf16.msra.mxu1 %v5162_v63  ;;  %v5239_v62 = vld [vmem:[%s6984_s7 + $0x164] ss:$28 sps:$4 sm:$0xff]  }
 0x39f   :  { %3730 = vmatprep.subr.bf16.mxu0 %v5167_v0  ;;  %3812 = vmatprep.subr.bf16.mxu1 %v5170_v1  ;;  %v5240_v63 = vld [vmem:[%s6984_s7 + $0x328] ss:$28 sps:$4 sm:$0xff]   ;;  %v5237_v0 = vld [vmem:[%s6984_s7 + $0x160] ss:$28 sps:$4 sm:$0xff]  }
 0x3a0   :  { %v5241_v1 = vld [vmem:[%s6984_s7 + $0x168] ss:$28 sps:$4 sm:$0xff]  }
 0x3a2   :  { %3731 = vmatpush1.bf16.msra.mxu0 %v5165_v2  ;;  %3813 = vmatpush1.bf16.msra.mxu1 %v5168_v3  ;;  %v5244_v2 = vld [vmem:[%s6984_s7 + $0x19c] ss:$28 sps:$4 sm:$0xff]  }
 0x3a3   :  { %3732 = vmatprep.subr.bf16.mxu0 %v5173_v4  ;;  %3814 = vmatprep.subr.bf16.mxu1 %v5176_v5  ;;  %v5245_v3 = vld [vmem:[%s6984_s7 + $0x360] ss:$28 sps:$4 sm:$0xff]   ;;  %v5242_v4 = vld [vmem:[%s6984_s7 + $0x198] ss:$28 sps:$4 sm:$0xff]  }
 0x3a4   :  { %v5246_v5 = vld [vmem:[%s6984_s7 + $0x1a0] ss:$28 sps:$4 sm:$0xff]  }
 0x3a6   :  { %3733 = vmatpush1.bf16.msra.mxu0 %v5171_v7  ;;  %3815 = vmatpush1.bf16.msra.mxu1 %v5174_v9  ;;  %v5249_v7 = vld [vmem:[%s6984_s7 + $0x1d4] ss:$28 sps:$4 sm:$0xff]  }
 0x3a7   :  { %3734 = vmatprep.subr.bf16.mxu0 %v5179_v10  ;;  %3816 = vmatprep.subr.bf16.mxu1 %v5182_v11  ;;  %v5250_v9 = vld [vmem:[%s6984_s7 + $0x558] ss:$28 sps:$4 sm:$0xff]   ;;  %v5247_v10 = vld [vmem:[%s6984_s7 + $0x1d0] ss:$28 sps:$4 sm:$0xff]  }
 0x3a8   :  { %v5251_v11 = vld [vmem:[%s6984_s7 + $0x398] ss:$28 sps:$4 sm:$0xff]  }
 0x3aa   :  { %3735 = vmatpush1.bf16.msra.mxu0 %v5177_v12  ;;  %3817 = vmatpush1.bf16.msra.mxu1 %v5180_v14  ;;  %v5254_v12 = vld [vmem:[%s6984_s7 + $0x20c] ss:$28 sps:$4 sm:$0xff]  }
 0x3ab   :  { %3736 = vmatprep.subr.bf16.mxu0 %v5185_v15  ;;  %3818 = vmatprep.subr.bf16.mxu1 %v5188_v16  ;;  %v5255_v14 = vld [vmem:[%s6984_s7 + $0x590] ss:$28 sps:$4 sm:$0xff]   ;;  %v5252_v15 = vld [vmem:[%s6984_s7 + $0x208] ss:$28 sps:$4 sm:$0xff]  }
 0x3ac   :  { %v5256_v16 = vld [vmem:[%s6984_s7 + $0x3d0] ss:$28 sps:$4 sm:$0xff]  }
 0x3ae   :  { %3737 = vmatpush1.bf16.msra.mxu0 %v5183_v18  ;;  %3819 = vmatpush1.bf16.msra.mxu1 %v5186_v17  ;;  %v5259_v18 = vld [vmem:[%s6984_s7 + $0x244] ss:$28 sps:$4 sm:$0xff]  }
 0x3af   :  { %3738 = vmatprep.subr.bf16.mxu0 %v5191_v19  ;;  %3820 = vmatprep.subr.bf16.mxu1 %v5194_v20  ;;  %v5260_v17 = vld [vmem:[%s6984_s7 + $0x5c8] ss:$28 sps:$4 sm:$0xff]   ;;  %v5257_v19 = vld [vmem:[%s6984_s7 + $0x240] ss:$28 sps:$4 sm:$0xff]  }
 0x3b0   :  { %v5261_v20 = vld [vmem:[%s6984_s7 + $0x408] ss:$28 sps:$4 sm:$0xff]  }
 0x3b2   :  { %3739 = vmatpush1.bf16.msra.mxu0 %v5189_v21  ;;  %3821 = vmatpush1.bf16.msra.mxu1 %v5192_v22  ;;  %v5264_v21 = vld [vmem:[%s6984_s7 + $0x27c] ss:$28 sps:$4 sm:$0xff]  }
 0x3b3   :  { %3740 = vmatprep.subr.bf16.mxu0 %v5197_v24  ;;  %3822 = vmatprep.subr.bf16.mxu1 %v5200_v25  ;;  %v5265_v22 = vld [vmem:[%s6984_s7 + $0x600] ss:$28 sps:$4 sm:$0xff]   ;;  %v5262_v24 = vld [vmem:[%s6984_s7 + $0x278] ss:$28 sps:$4 sm:$0xff]  }
 0x3b4   :  { %v5266_v25 = vld [vmem:[%s6984_s7 + $0x440] ss:$28 sps:$4 sm:$0xff]  }
 0x3b6   :  { %3741 = vmatpush1.bf16.msra.mxu0 %v5195_v27  ;;  %3823 = vmatpush1.bf16.msra.mxu1 %v5198_v28  ;;  %v5269_v27 = vld [vmem:[%s6984_s7 + $0x2b4] ss:$28 sps:$4 sm:$0xff]  }
 0x3b7   :  { %3742 = vmatprep.subr.bf16.mxu0 %v5203_v31  ;;  %3824 = vmatprep.subr.bf16.mxu1 %v5206_v32  ;;  %v5270_v28 = vld [vmem:[%s6984_s7 + $0x638] ss:$28 sps:$4 sm:$0xff]   ;;  %v5274_v32 = vld [vmem:[%s6984_s7 + $0x2ec] ss:$28 sps:$4 sm:$0xff]  }
 0x3b8   :  { %v5271_v31 = vld [vmem:[%s6984_s7 + $0x478] ss:$28 sps:$4 sm:$0xff]  }
 0x3ba   :  { %3743 = vmatpush1.bf16.msra.mxu0 %v5201_v33  ;;  %3825 = vmatpush1.bf16.msra.mxu1 %v5204_v8  ;;  %v5275_v33 = vld [vmem:[%s6984_s7 + $0x670] ss:$28 sps:$4 sm:$0xff]   ;;  %v5272_v8 = vld [vmem:[%s6984_s7 + $0x2e8] ss:$28 sps:$4 sm:$0xff]  }
 0x3bb   :  { %3835 = vmatprep.subr.bf16.mxu0 %v5209_v35  ;;  %4549 = vmatprep.subr.bf16.mxu1 %v5210_v36  ;;  %v5279_v35 = vld [vmem:[%s6984_s7 + $0x324] ss:$28 sps:$4 sm:$0xff]  }
 0x3bc   :  { %v5280_v36 = vld [vmem:[%s6984_s7 + $0x6a8] ss:$28 sps:$4 sm:$0xff]  }
 0x3bd   :  { %3745 = vmatmul.mubr.bf16.vlgmr.msra.gmra.mrb[8].mxu0 %v6663_v42  ;;  %3827 = vmatmul.mubr.bf16.vlgmr.msra.gmra.mrb[16].mxu1 %v6663_v42 }
 0x3be   :  { %3836 = vmatpush1.bf16.msra.mxu0 %v5207_v39  ;;  %3867 = vmatprep.mubr.bf16.mxu0 %v6453_v23  ;;  %v5277_v39 = vld [vmem:[%s6984_s7 + $0x320] ss:$28 sps:$4 sm:$0xff]  }
 0x3bf   :  { %4550 = vmatpush3.bf16.msra.mxu1 %v5211_v13  ;;  %3949 = vmatprep.mubr.bf16.mxu1 %v6453_v23  ;;  %v5221_v23 = vld [vmem:[%s6984_s7 + $0x88] ss:$28 sps:$4 sm:$0xff]  }
 0x3c0   :  { %3837 = vmatprep.subr.bf16.mxu0 %v5214_v43  ;;  %4551 = vmatprep.subr.bf16.mxu1 %v5215_v44  ;;  %v5281_v13 = vld [vmem:[%s6984_s7 + $0x4e8] ss:$28 sps:$4 sm:$0xff]   ;;  %v5284_v43 = vld [vmem:[%s6984_s7 + $0x35c] ss:$28 sps:$4 sm:$0xff]  }
 0x3c1   :  { %v5285_v44 = vld [vmem:[%s6984_s7 + $0x6e0] ss:$28 sps:$4 sm:$0xff]  }
 0x3c2   :  { %3838 = vmatpush1.bf16.msra.mxu0 %v5212_v45  ;;  %v5282_v45 = vld [vmem:[%s6984_s7 + $0x358] ss:$28 sps:$4 sm:$0xff]  }
 0x3c3   :  { %4552 = vmatpush3.bf16.msra.mxu1 %v5216_v46  ;;  %3839 = vmatprep.subr.bf16.mxu0 %v5219_v47  ;;  %v5286_v46 = vld [vmem:[%s6984_s7 + $0x520] ss:$28 sps:$4 sm:$0xff]   ;;  %v5289_v47 = vld [vmem:[%s6984_s7 + $0x394] ss:$28 sps:$4 sm:$0xff]  }
 0x3c4   :  { %4553 = vmatprep.subr.bf16.mxu1 %v5220_v48  ;;  %v5287_v48 = vld [vmem:[%s6984_s7 + $0x390] ss:$28 sps:$4 sm:$0xff]  }
 0x3c6   :  { %3840 = vmatpush1.bf16.msra.mxu0 %v5217_v49  ;;  %v5292_v49 = vld [vmem:[%s6984_s7 + $0x3cc] ss:$28 sps:$4 sm:$0xff]  }
 0x3c7   :  { %4554 = vmatpush3.bf16.msra.mxu1 %v5221_v23  ;;  %3841 = vmatprep.subr.bf16.mxu0 %v5224_v50  ;;  %v5290_v23 = vld [vmem:[%s6984_s7 + $0x3c8] ss:$28 sps:$4 sm:$0xff]  }
 0x3c8   :  { %4555 = vmatprep.subr.bf16.mxu1 %v5225_v51  ;;  %v5295_v50 = vld [vmem:[%s6984_s7 + $0x404] ss:$28 sps:$4 sm:$0xff]  }
 0x3c9   :  { %v5293_v51 = vld [vmem:[%s6984_s7 + $0x400] ss:$28 sps:$4 sm:$0xff]  }
 0x3ca   :  { %3842 = vmatpush1.bf16.msra.mxu0 %v5222_v52  ;;  %v5301_v52 = vld [vmem:[%s6984_s7 + $0x474] ss:$28 sps:$4 sm:$0xff]  }
 0x3cb   :  { %4556 = vmatpush3.bf16.msra.mxu1 %v5226_v53  ;;  %3843 = vmatprep.subr.bf16.mxu0 %v5229_v54  ;;  %v5299_v53 = vld [vmem:[%s6984_s7 + $0x470] ss:$28 sps:$4 sm:$0xff]  }
 0x3cc   :  { %4557 = vmatprep.subr.bf16.mxu1 %v5230_v55  ;;  %v5304_v54 = vld [vmem:[%s6984_s7 + $0x4ac] ss:$28 sps:$4 sm:$0xff]  }
 0x3cd   :  { %v5302_v55 = vld [vmem:[%s6984_s7 + $0x4a8] ss:$28 sps:$4 sm:$0xff]  }
 0x3ce   :  { %3844 = vmatpush1.bf16.msra.mxu0 %v5227_v56  ;;  %v5307_v56 = vld [vmem:[%s6984_s7 + $0x4e4] ss:$28 sps:$4 sm:$0xff]  }
 0x3cf   :  { %4558 = vmatpush3.bf16.msra.mxu1 %v5231_v57  ;;  %3845 = vmatprep.subr.bf16.mxu0 %v5234_v58  ;;  %v5305_v57 = vld [vmem:[%s6984_s7 + $0x4e0] ss:$28 sps:$4 sm:$0xff]  }
 0x3d0   :  { %4559 = vmatprep.subr.bf16.mxu1 %v5235_v59  ;;  %v5310_v58 = vld [vmem:[%s6984_s7 + $0x51c] ss:$28 sps:$4 sm:$0xff]  }
 0x3d1   :  { %v5308_v59 = vld [vmem:[%s6984_s7 + $0x518] ss:$28 sps:$4 sm:$0xff]  }
 0x3d2   :  { %3846 = vmatpush1.bf16.msra.mxu0 %v5232_v60  ;;  %v5313_v60 = vld [vmem:[%s6984_s7 + $0x554] ss:$28 sps:$4 sm:$0xff]  }
 0x3d3   :  { %4560 = vmatpush3.bf16.msra.mxu1 %v5236_v61  ;;  %3847 = vmatprep.subr.bf16.mxu0 %v5239_v62  ;;  %v5311_v61 = vld [vmem:[%s6984_s7 + $0x550] ss:$28 sps:$4 sm:$0xff]  }
 0x3d4   :  { %4561 = vmatprep.subr.bf16.mxu1 %v5240_v63  ;;  %v5316_v62 = vld [vmem:[%s6984_s7 + $0x58c] ss:$28 sps:$4 sm:$0xff]  }
 0x3d5   :  { %v5314_v63 = vld [vmem:[%s6984_s7 + $0x588] ss:$28 sps:$4 sm:$0xff]  }
 0x3d6   :  { %3848 = vmatpush1.bf16.msra.mxu0 %v5237_v0  ;;  %v5319_v0 = vld [vmem:[%s6984_s7 + $0x5c4] ss:$28 sps:$4 sm:$0xff]  }
 0x3d7   :  { %4562 = vmatpush3.bf16.msra.mxu1 %v5241_v1  ;;  %3849 = vmatprep.subr.bf16.mxu0 %v5244_v2  ;;  %v5317_v1 = vld [vmem:[%s6984_s7 + $0x5c0] ss:$28 sps:$4 sm:$0xff]  }
 0x3d8   :  { %4563 = vmatprep.subr.bf16.mxu1 %v5245_v3  ;;  %v5322_v2 = vld [vmem:[%s6984_s7 + $0x5fc] ss:$28 sps:$4 sm:$0xff]  }
 0x3d9   :  { %v5320_v3 = vld [vmem:[%s6984_s7 + $0x5f8] ss:$28 sps:$4 sm:$0xff]  }
 0x3da   :  { %3850 = vmatpush1.bf16.msra.mxu0 %v5242_v4  ;;  %v5325_v4 = vld [vmem:[%s6984_s7 + $0x634] ss:$28 sps:$4 sm:$0xff]  }
 0x3db   :  { %4564 = vmatpush3.bf16.msra.mxu1 %v5246_v5  ;;  %3851 = vmatprep.subr.bf16.mxu0 %v5249_v7  ;;  %v5323_v5 = vld [vmem:[%s6984_s7 + $0x630] ss:$28 sps:$4 sm:$0xff]  }
 0x3dc   :  { %4571 = vmatprep.subr.bf16.mxu1 %v5250_v9  ;;  %v5328_v7 = vld [vmem:[%s6984_s7 + $0x66c] ss:$28 sps:$4 sm:$0xff]  }
 0x3dd   :  { %v5326_v9 = vld [vmem:[%s6984_s7 + $0x668] ss:$28 sps:$4 sm:$0xff]  }
 0x3de   :  { %3950 = vmatmul.mubr.bf16.vlgmr.msra.gmra.mrb[20].mxu1 %v6461_v26  ;;  %3852 = vmatpush1.bf16.msra.mxu0 %v5247_v10  ;;  %v5331_v10 = vld [vmem:[%s6984_s7 + $0x6a4] ss:$28 sps:$4 sm:$0xff]  }
 0x3df   :  { %4572 = vmatpush3.bf16.msra.mxu1 %v5251_v11  ;;  %3989 = vmatprep.mubr.bf16.mxu1 %v6471_v29  ;;  %v5329_v11 = vld [vmem:[%s6984_s7 + $0x6a0] ss:$28 sps:$4 sm:$0xff]  }
 0x3e0   :  { %3853 = vmatprep.subr.bf16.mxu0 %v5254_v12  ;;  %4573 = vmatprep.subr.bf16.mxu1 %v5255_v14  ;;  %v5334_v12 = vld [vmem:[%s6984_s7 + $0x6dc] ss:$28 sps:$4 sm:$0xff]  }
 0x3e1   :  { %v5332_v14 = vld [vmem:[%s6984_s7 + $0x6d8] ss:$28 sps:$4 sm:$0xff]  }
 0x3e2   :  { %3854 = vmatpush1.bf16.msra.mxu0 %v5252_v15  ;;  %v2482_v15 = vld [vmem:[%s6985_s8] sm:$0x7f] }
 0x3e3   :  { %4574 = vmatpush3.bf16.msra.mxu1 %v5256_v16  ;;  %3855 = vmatprep.subr.bf16.mxu0 %v5259_v18  ;;  %v2487_v16 = vrot.slane %v2482_v15, %v6079_v38  ;;  %v2495_v18 = vrot.slane %v2482_v15, %v6127_v6 }
 0x3e4   :  { %4575 = vmatprep.subr.bf16.mxu1 %v5260_v17  ;;  %v2491_v17 = vrot.slane %v2482_v15, %v6085_v40 }
 0x3e6   :  { %3856 = vmatpush1.bf16.msra.mxu0 %v5257_v19  ;;  %v2499_v19 = vrot.slane %v2482_v15, %v6088_v41 }
 0x3e7   :  { %4576 = vmatpush3.bf16.msra.mxu1 %v5261_v20  ;;  %3857 = vmatprep.subr.bf16.mxu0 %v5264_v21 }
 0x3e8   :  { %4577 = vmatprep.subr.bf16.mxu1 %v5265_v22 }
 0x3ea   :  { %3858 = vmatpush1.bf16.msra.mxu0 %v5262_v24 }
 0x3eb   :  { %4578 = vmatpush3.bf16.msra.mxu1 %v5266_v25  ;;  %3859 = vmatprep.subr.bf16.mxu0 %v5269_v27 }
 0x3ec   :  { %4579 = vmatprep.subr.bf16.mxu1 %v5270_v28 }
 0x3ee   :  { %3860 = vmatpush1.bf16.msra.mxu0 %v5267_v30 }
 0x3ef   :  { %4580 = vmatpush3.bf16.msra.mxu1 %v5271_v31  ;;  %3861 = vmatprep.subr.bf16.mxu0 %v5274_v32 }
 0x3f0   :  { %4581 = vmatprep.subr.bf16.mxu1 %v5275_v33 }
 0x3f2   :  { %3862 = vmatpush1.bf16.msra.mxu0 %v5272_v8 }
 0x3f3   :  { %4582 = vmatpush3.bf16.msra.mxu1 %v5276_v34  ;;  %3863 = vmatprep.subr.bf16.mxu0 %v5279_v35  ;;  %v2510_v34 = vsub.s32 6, %v6076_v37 }
 0x3f4   :  { %4583 = vmatprep.subr.bf16.mxu1 %v5280_v36 }
 0x3f5   :  { %v2511_v35 = vrot.slane %v2482_v15, %v2510_v34 }
 0x3f6   :  { %3864 = vmatpush1.bf16.msra.mxu0 %v5277_v39 }
 0x3f7   :  { %4584 = vmatpush3.bf16.msra.mxu1 %v5281_v13  ;;  %3865 = vmatprep.subr.bf16.mxu0 %v5284_v43 }
 0x3f8   :  { %4585 = vmatprep.subr.bf16.mxu1 %v5285_v44 }
 0x3fa   :  { %3866 = vmatpush1.bf16.msra.mxu0 %v5282_v45 }
 0x3fb   :  { %4586 = vmatpush3.bf16.msra.mxu1 %v5286_v46  ;;  %3876 = vmatprep.subr.bf16.mxu0 %v5289_v47  ;;  %v2502_v47 = vsub.s32 4, %v6076_v37 }
 0x3fd   :  { %3868 = vmatmul.mubr.bf16.vlgmr.msra.gmra.mrb[12].mxu0 %v6461_v26  ;;  %v5298_v26 = vld [vmem:[%s6984_s7 + $0x43c] ss:$28 sps:$4 sm:$0xff]  }
 0x3fe   :  { %3990 = vmatmul.mubr.bf16.vlgmr.msra.gmra.mrb[24].mxu1 %v6663_v42  ;;  %3877 = vmatpush1.bf16.msra.mxu0 %v5287_v48  ;;  %v2506_v48 = vsub.s32 5, %v6076_v37 }
 0x3ff   :  { %3908 = vmatprep.mubr.bf16.mxu0 %v6471_v29  ;;  %3878 = vmatprep.subr.bf16.mxu0 %v5292_v49  ;;  %v5296_v29 = vld [vmem:[%s6984_s7 + $0x438] ss:$28 sps:$4 sm:$0xff]   ;;  %v2503_v49 = vrot.slane %v2482_v15, %v2502_v47  ;;  %s5360_s7 = smov [#allocation2]  }
 0x400   :  { %s4010_s8 = sshll.u32 %s5360_s7, 4  ;;  %s4011_s8 = int_to_ptr.vmem [resolvable:$true] %s4010_s8 }
 0x401   :  { %s5335_s30 = scalar_lea.vmem %s4011_s8, 896  ;;  %p5340_p1 = scmp.lt.s32.totalorder %s4011_s8, %s4011_s8 }
 0x402   :  { %3879 = vmatpush1.bf16.msra.mxu0 %v5290_v23  ;;  %v2507_v23 = vrot.slane %v2482_v15, %v2506_v48  ;;  %p5336_p0 = scmp.ne.s32.totalorder %s4011_s8, %s5335_s30  ;;  %p5341_p2 = scmp.lt.s32.totalorder %s5335_s30, %s5335_s30 }
 0x403   :  { %3880 = vmatprep.subr.bf16.mxu0 %v5295_v50 }
 0x404   :  { %p5342_p3 = por %p5341_p2, %p5340_p1 }
 0x406   :  { %3881 = vmatpush1.bf16.msra.mxu0 %v5293_v51  ;;  %p5343_p4 = pnand %p5342_p3, %p5336_p0 }
 0x407   :  { %3882 = vmatprep.subr.bf16.mxu0 %v5298_v26 }
 0x40a   :  { %3883 = vmatpush1.bf16.msra.mxu0 %v5296_v29 }
 0x40b   :  { %3884 = vmatprep.subr.bf16.mxu0 %v5301_v52 }
 0x40e   :  { %3885 = vmatpush1.bf16.msra.mxu0 %v5299_v53 }
 0x40f   :  { %3886 = vmatprep.subr.bf16.mxu0 %v5304_v54 }
 0x412   :  { %3887 = vmatpush1.bf16.msra.mxu0 %v5302_v55 }
 0x413   :  { %3888 = vmatprep.subr.bf16.mxu0 %v5307_v56 }
 0x416   :  { %3889 = vmatpush1.bf16.msra.mxu0 %v5305_v57 }
 0x417   :  { %3890 = vmatprep.subr.bf16.mxu0 %v5310_v58 }
 0x41a   :  { %3891 = vmatpush1.bf16.msra.mxu0 %v5308_v59 }
 0x41b   :  { %3892 = vmatprep.subr.bf16.mxu0 %v5313_v60 }
 0x41e   :  { %3893 = vmatpush1.bf16.msra.mxu0 %v5311_v61 }
 0x41f   :  { %3894 = vmatprep.subr.bf16.mxu0 %v5316_v62 }
 0x422   :  { %3895 = vmatpush1.bf16.msra.mxu0 %v5314_v63 }
 0x423   :  { %3896 = vmatprep.subr.bf16.mxu0 %v5319_v0 }
 0x426   :  { %3897 = vmatpush1.bf16.msra.mxu0 %v5317_v1 }
 0x427   :  { %3898 = vmatprep.subr.bf16.mxu0 %v5322_v2 }
 0x42a   :  { %3899 = vmatpush1.bf16.msra.mxu0 %v5320_v3 }
 0x42b   :  { %3900 = vmatprep.subr.bf16.mxu0 %v5325_v4 }
 0x42e   :  { %3901 = vmatpush1.bf16.msra.mxu0 %v5323_v5 }
 0x42f   :  { %3902 = vmatprep.subr.bf16.mxu0 %v5328_v7 }
 0x432   :  { %3903 = vmatpush1.bf16.msra.mxu0 %v5326_v9 }
 0x433   :  { %3904 = vmatprep.subr.bf16.mxu0 %v5331_v10 }
 0x436   :  { %3905 = vmatpush1.bf16.msra.mxu0 %v5329_v11 }
 0x437   :  { %3906 = vmatprep.subr.bf16.mxu0 %v5334_v12 }
 0x43a   :  { %3907 = vmatpush1.bf16.msra.mxu0 %v5332_v14 }
 0x43d   :  { %3909 = vmatmul.mubr.bf16.vlgmr.msra.gmra.mrb[12].mxu0 %v6663_v42 }
 0x490   :  { %v3746_v20 = vpop.f32.mrb[8].mxu0  ;;  %v3828_v21 = vpop.f32.mrb[16].mxu1 }
 0x491   :  { %v4597_v22 = vadd.f32 %v3746_v20, %v2487_v16  ;;  %v4599_v24 = vadd.f32 %v3828_v21, %v2495_v18  ;;  %v3748_v25 = vpop.f32.mrb[9].mxu0  ;;  %v3830_v27 = vpop.f32.mrb[17].mxu1 }
 0x492   :  { %v4598_v28 = vadd.f32 %v3748_v25, %v2491_v17  ;;  %v4600_v42 = vadd.f32 %v3830_v27, %v2499_v19  ;;  %v3750_v30 = vpop.f32.mrb[10].mxu0  ;;  %v3832_v31 = vpop.f32.mrb[18].mxu1 }
 0x493   :  { %3997 = vst [vmem:[#allocation2] sm:$0xff] %v4597_v22  ;;  %3999 = vst [vmem:[#allocation2 + $0x10] sm:$0xff] %v4599_v24  ;;  %v3751_v32 = vpop.f32.mrb[11].mxu0  ;;  %v3833_v38 = vpop.f32.mrb[19].mxu1 }
 0x494   :  { %3998 = vst [vmem:[#allocation2 + $0x8] sm:$0xff] %v4598_v28  ;;  %4000 = vst [vmem:[#allocation2 + $0x18] sm:$0xff] %v4600_v42 }
 0x4b1   :  { %v4565_v6 = vpop.f32.mrb[20].mxu1 }
 0x4b2   :  { %v4566_v40 = vpop.f32.mrb[21].mxu1 }
 0x4b3   :  { %v4567_v33 = vadd.f32 %v4566_v40, %v4565_v6  ;;  %v4568_v41 = vpop.f32.mrb[22].mxu1 }
 0x4b4   :  { %v4569_v8 = vpop.f32.mrb[23].mxu1 }
 0x4b5   :  { %v3952_v13 = vadd.f32 %v4567_v33, %v2511_v35 }
 0x4d1   :  { %v4587_v36 = vpop.f32.mrb[24].mxu1 }
 0x4d2   :  { %v4588_v39 = vpop.f32.mrb[25].mxu1 }
 0x4d3   :  { %v4589_v43 = vadd.f32 %v4588_v39, %v4587_v36  ;;  %v4590_v44 = vpop.f32.mrb[26].mxu1 }
 0x4d4   :  { %v4591_v45 = vpop.f32.mrb[27].mxu1 }
 0x4d5   :  { %v3992_v46 = vadd.f32 %v4589_v43, %v3952_v13 }
 0x4d7   :  { %4003 = vst.msk [vmem:[#allocation2 + $0x30] sm:$0xff] %vm1246_vm0, %v3992_v46 }
 0x510   :  { %v3910_v50 = vpop.f32.mrb[12].mxu0 }
 0x511   :  { %v4601_v51 = vadd.f32 %v3910_v50, %v2503_v49  ;;  %v3912_v26 = vpop.f32.mrb[13].mxu0 }
 0x512   :  { %v4602_v29 = vadd.f32 %v3912_v26, %v2507_v23  ;;  %v3914_v52 = vpop.f32.mrb[14].mxu0 }
 0x513   :  { %4001 = vst [vmem:[#allocation2 + $0x20] sm:$0xff] %v4601_v51  ;;  %v3915_v53 = vpop.f32.mrb[15].mxu0 }
 0x514   :  { %4002 = vst [vmem:[#allocation2 + $0x28] sm:$0xff] %v4602_v29 }
 0x515   :  { %5346 = shalt.err (!%p5343_p4)
}
 0x516   :  { %s5347_s11 = scalar_lea.hbm %s6986_s9, 896 }
 0x517   :  { %p5348_p5 = scmp.ne.s32.totalorder %s6986_s9, %s5347_s11  ;;  %p5351_p6 = scmp.lt.u32.totalorder %s5347_s11, %s6986_s9 }
 0x519   :  { %p5353_p7 = pnand %p5351_p6, %p5348_p5 }
 0x51b   :  { %5356 = shalt.err (!%p5353_p7)
}
 0x51c   :  { %4013 = dma.vmem_to_hbm [thread:$0]  %s4011_s8, 896, %s6986_s9, [#allocation3]  }
 0x51d   :  { %5357 = dma.done.wait [#allocation3], 896  }
 0x51e   :  { %5358 = vsyncadd [#allocation3], 4294966400 }
 0x51f   :  { %4017 = vsyncpa [#allocation3], 1 }

</bundles_post_ra>
